<compile_context>
chip_gen: v7x
topology: tpu7x:2x2x1
jax: 0.10.0
libtpu: 0.0.40
codegen_flags: <defaults>
</compile_context>

<pallas_src>
import jax
import jax.numpy as jnp
from jax import lax
from jax.experimental import pallas as pl
from jax.experimental.pallas import tpu as pltpu

HEADS = 4
DIM_HEAD = 32
HIDDEN = HEADS * DIM_HEAD        # 128
EPS = 1e-5                       # GroupNorm default eps
SCALE = DIM_HEAD ** (-0.5)


def linear_attention_kernel(x_ref, w_qkvT_ref, w_out_ref, params_ref, o_ref):
    # x_ref:      (Bt, C, N)       Bt batch samples, channels x flattened spatial
    # w_qkvT_ref: (C, 3*HIDDEN)    transposed qkv 1x1-conv weight (lane-dense: 384)
    # w_out_ref:  (C, HIDDEN)      to_out 1x1-conv weight
    # params_ref: (C, 3)           columns: [bias, gamma, beta]
    # o_ref:      (Bt, C, N)
    bt, c, n = x_ref.shape

    w_qkvT = w_qkvT_ref[...]                      # (C, 3*HIDDEN)
    w_out = w_out_ref[...]                        # (C, HIDDEN)
    params = params_ref[...]                      # (C, 3)
    bias = params[:, 0:1]                         # (C, 1)
    gamma = params[:, 1:2]
    beta = params[:, 2:3]
    inv_cn = 1.0 / (c * n)

    for s in range(bt):                           # static, unrolled
        x = x_ref[s]                              # (C, N)

        # qkv 1x1 conv == channel matmul (contract over C on both operands).
        qkv = lax.dot_general(w_qkvT, x, (((0,), (0,)), ((), ())),
                              preferred_element_type=jnp.float32)   # (3*HIDDEN, N)

        # k: softmax over the spatial axis, vectorized across all heads
        # (per-row reduction -> no per-head slicing needed here).
        k_all = qkv[HIDDEN:2 * HIDDEN, :]
        k_all = k_all - jnp.max(k_all, axis=1, keepdims=True)
        k_exp = jnp.exp(k_all)
        k_soft = k_exp * pl.reciprocal(
            jnp.sum(k_exp, axis=1, keepdims=True), approx=True)     # (HIDDEN, N)

        q_cols = []
        m_cols = []
        for h in range(HEADS):
            lo, hi = h * DIM_HEAD, (h + 1) * DIM_HEAD

            # q: softmax over the head-feature axis; SCALE folded into the
            # (1, N) reciprocal so only one broadcast multiply hits the tile.
            qh = qkv[lo:hi, :]
            qh = qh - jnp.max(qh, axis=0, keepdims=True)
            q_exp = jnp.exp(qh)
            q_cols.append(
                q_exp * (pl.reciprocal(jnp.sum(q_exp, axis=0, keepdims=True),
                                       approx=True) * SCALE))        # (Dh, N)

            kh = k_soft[lo:hi, :]
            vh = qkv[2 * HIDDEN + lo:2 * HIDDEN + hi, :]

            # context[d, e] = sum_n k[d, n] * v[e, n]
            ctx = lax.dot_general(kh, vh, (((1,), (1,)), ((), ())),
                                  preferred_element_type=jnp.float32)  # (Dh, Dh)

            # Fused tiny matrix: M_h[c, d] = sum_e w_out[c, lo+e] * ctx[d, e]
            m_cols.append(
                lax.dot_general(w_out[:, lo:hi], ctx, (((1,), (1,)), ((), ())),
                                preferred_element_type=jnp.float32))   # (C, Dh)

        q_soft = jnp.concatenate(q_cols, axis=0)    # (HIDDEN, N)
        m_fused = jnp.concatenate(m_cols, axis=1)   # (C, HIDDEN)

        # One K=HIDDEN=128 contraction replaces the per-head apply matmuls,
        # the per-head to_out matmuls and the cross-head accumulation adds.
        y = jnp.dot(m_fused, q_soft,
                    preferred_element_type=jnp.float32) + bias        # (C, N)

        # GroupNorm(1, dim): per-sample stats over all (C, N) elements,
        # single reduction pass (sum, sum of squares).
        s1 = jnp.sum(y)
        s2 = jnp.sum(y * y)
        mean = s1 * inv_cn
        var = s2 * inv_cn - mean * mean
        y_norm = (y - mean) * lax.rsqrt(var + EPS)
        o_ref[s] = y_norm * gamma + beta


def _samples_per_block(batch):
    """Largest divisor of `batch` that still leaves >= 2 grid steps
    (so both v7x TensorCores get work)."""
    if batch <= 2:
        return 1
    for bt in range(batch // 2, 0, -1):
        if batch % bt == 0:
            return bt
    return 1


def linear_attention(x, w_qkv, w_out, b_out, gamma, beta, samples_per_block=None):
    """x: (B, C, H, W) float32 NCHW. Returns (B, C, H, W) float32."""
    B, C, H, W = x.shape
    N = H * W
    x_flat = x.reshape(B, C, N)
    w_qkvT = jnp.transpose(w_qkv)                          # (C, 3*HIDDEN), lane-dense
    params = jnp.stack([b_out, gamma, beta], axis=1)       # (C, 3), one operand

    bt = samples_per_block or _samples_per_block(B)
    assert B % bt == 0, "batch must be divisible by samples_per_block"
    grid = (B // bt,)

    out = pl.pallas_call(
        linear_attention_kernel,
        out_shape=jax.ShapeDtypeStruct((B, C, N), jnp.float32),
        grid=grid,
        in_specs=[
            pl.BlockSpec((bt, C, N), lambda i: (i, 0, 0)),      # x (Bt samples)
            pl.BlockSpec((C, 3 * HIDDEN), lambda i: (0, 0)),    # w_qkv^T
            pl.BlockSpec((C, HIDDEN), lambda i: (0, 0)),        # w_out
            pl.BlockSpec((C, 3), lambda i: (0, 0)),             # [bias|gamma|beta]
        ],
        out_specs=pl.BlockSpec((bt, C, N), lambda i: (i, 0, 0)),
        compiler_params=pltpu.CompilerParams(
            dimension_semantics=("parallel",)),
    )(x_flat, w_qkvT, w_out, params)

    return out.reshape(B, C, H, W)


def reference(x, w_qkv, w_out, b_out, gamma, beta):
    """Pure-JAX reference matching the PyTorch module semantics."""
    B, C, H, W = x.shape
    N = H * W
    xf = x.reshape(B, C, N)
    qkv = jnp.einsum('oc,bcn->bon', w_qkv, xf)                    # (B, 3*HIDDEN, N)
    qkv = qkv.reshape(B, 3, HEADS, DIM_HEAD, N)
    q, k, v = qkv[:, 0], qkv[:, 1], qkv[:, 2]
    q = jax.nn.softmax(q, axis=-2) * SCALE
    k = jax.nn.softmax(k, axis=-1)
    context = jnp.einsum('bhdn,bhen->bhde', k, v)
    out = jnp.einsum('bhde,bhdn->bhen', context, q)
    out = out.reshape(B, HIDDEN, N)
    y = jnp.einsum('oc,bcn->bon', w_out, out) + b_out[None, :, None]
    mean = y.mean(axis=(1, 2), keepdims=True)
    var = ((y - mean) ** 2).mean(axis=(1, 2), keepdims=True)
    y = (y - mean) / jnp.sqrt(var + EPS)
    y = y * gamma[None, :, None] + beta[None, :, None]
    return y.reshape(B, C, H, W)


if __name__ == "__main__":
    B, DIM, H, W = 2, 4, 16, 16

    key = jax.random.PRNGKey(0)
    k1, k2, k3, k4, k5, k6 = jax.random.split(key, 6)
    x = jax.random.normal(k1, (B, DIM, H, W), jnp.float32)
    w_qkv = 0.2 * jax.random.normal(k2, (3 * HIDDEN, DIM), jnp.float32)
    w_out = 0.1 * jax.random.normal(k3, (DIM, HIDDEN), jnp.float32)
    b_out = 0.1 * jax.random.normal(k4, (DIM,), jnp.float32)
    gamma = 1.0 + 0.1 * jax.random.normal(k5, (DIM,), jnp.float32)
    beta = 0.1 * jax.random.normal(k6, (DIM,), jnp.float32)

    y = linear_attention(x, w_qkv, w_out, b_out, gamma, beta)
    y = jax.block_until_ready(y)

    y_ref = reference(x, w_qkv, w_out, b_out, gamma, beta)
    err = float(jnp.max(jnp.abs(y - y_ref)))
    assert jnp.allclose(y, y_ref, rtol=1e-3, atol=1e-3), f"max abs err {err}"

    print("KERNEL_OK")
</pallas_src>

<mosaic_0001>
module attributes {stable_mosaic.version = 11 : i64} {
  func.func @linear_attention_kernel(%arg0: i32, %arg1: memref<1x4x256xf32, #tpu.memory_space<vmem>>, %arg2: memref<4x384xf32, #tpu.memory_space<vmem>>, %arg3: memref<4x128xf32, #tpu.memory_space<vmem>>, %arg4: memref<4x3xf32, #tpu.memory_space<vmem>>, %arg5: memref<1x4x256xf32, #tpu.memory_space<vmem>>) attributes {dimension_semantics = [#tpu.dimension_semantics<parallel>], iteration_bounds = array<i64: 2>, scalar_prefetch = 0 : i64, scratch_operands = 0 : i64, tpu.core_type = #tpu.core_type<tc>, window_params = [{transform_indices = @transform_0, window_bounds = array<i64: 1, 4, 256>}, {pipeline_mode = #tpu.pipeline_mode<synchronous>, transform_indices = @transform_1, window_bounds = array<i64: 4, 384>}, {pipeline_mode = #tpu.pipeline_mode<synchronous>, transform_indices = @transform_2, window_bounds = array<i64: 4, 128>}, {pipeline_mode = #tpu.pipeline_mode<synchronous>, transform_indices = @transform_3, window_bounds = array<i64: 4, 3>}, {transform_indices = @transform_4, window_bounds = array<i64: 1, 4, 256>}]} {
    %c0 = arith.constant 0 : index
    %c0_0 = arith.constant 0 : index
    %0 = vector.load %arg2[%c0, %c0_0] : memref<4x384xf32, #tpu.memory_space<vmem>>, vector<4x384xf32>
    %c0_1 = arith.constant 0 : index
    %c0_2 = arith.constant 0 : index
    %1 = vector.load %arg3[%c0_1, %c0_2] : memref<4x128xf32, #tpu.memory_space<vmem>>, vector<4x128xf32>
    %c0_3 = arith.constant 0 : index
    %c0_4 = arith.constant 0 : index
    %2 = vector.load %arg4[%c0_3, %c0_4] : memref<4x3xf32, #tpu.memory_space<vmem>>, vector<4x3xf32>
    %3 = vector.extract_strided_slice %2 {offsets = [0, 0], sizes = [4, 1], strides = [1, 1]} : vector<4x3xf32> to vector<4x1xf32>
    %4 = vector.extract_strided_slice %2 {offsets = [0, 1], sizes = [4, 1], strides = [1, 1]} : vector<4x3xf32> to vector<4x1xf32>
    %5 = vector.extract_strided_slice %2 {offsets = [0, 2], sizes = [4, 1], strides = [1, 1]} : vector<4x3xf32> to vector<4x1xf32>
    %c0_5 = arith.constant 0 : index
    %c0_6 = arith.constant 0 : index
    %c0_7 = arith.constant 0 : index
    %6 = vector.load %arg1[%c0_5, %c0_6, %c0_7] : memref<1x4x256xf32, #tpu.memory_space<vmem>>, vector<1x4x256xf32>
    %7 = vector.shape_cast %6 : vector<1x4x256xf32> to vector<4x256xf32>
    %cst = arith.constant dense<0.000000e+00> : vector<384x256xf32>
    %8 = tpu.matmul %0, %7, %cst {dimension_numbers = #tpu.dot_dimension_numbers<[0], [0], [1], [1], [0, 1, 1, 1], [], []>} : vector<4x384xf32>, vector<4x256xf32>, vector<384x256xf32> -> vector<384x256xf32>
    %9 = vector.extract_strided_slice %8 {offsets = [128, 0], sizes = [128, 256], strides = [1, 1]} : vector<384x256xf32> to vector<128x256xf32>
    %cst_8 = arith.constant dense<0xFF800000> : vector<128xf32>
    %10 = vector.multi_reduction <maximumf>, %9, %cst_8 [1] : vector<128x256xf32> to vector<128xf32>
    %11 = vector.shape_cast %10 : vector<128xf32> to vector<128x1xf32>
    %12 = vector.broadcast %11 : vector<128x1xf32> to vector<128x256xf32>
    %13 = arith.subf %9, %12 : vector<128x256xf32>
    %14 = math.exp %13 : vector<128x256xf32>
    %cst_9 = arith.constant dense<0.000000e+00> : vector<128xf32>
    %15 = vector.multi_reduction <add>, %14, %cst_9 [1] : vector<128x256xf32> to vector<128xf32>
    %16 = vector.shape_cast %15 : vector<128xf32> to vector<128x1xf32>
    %17 = tpu.reciprocal %16 {approx = true} : vector<128x1xf32> -> vector<128x1xf32>
    %18 = vector.broadcast %17 : vector<128x1xf32> to vector<128x256xf32>
    %19 = arith.mulf %14, %18 : vector<128x256xf32>
    %20 = vector.extract_strided_slice %8 {offsets = [0, 0], sizes = [32, 256], strides = [1, 1]} : vector<384x256xf32> to vector<32x256xf32>
    %cst_10 = arith.constant dense<0xFF800000> : vector<256xf32>
    %21 = vector.multi_reduction <maximumf>, %20, %cst_10 [0] : vector<32x256xf32> to vector<256xf32>
    %22 = vector.shape_cast %21 : vector<256xf32> to vector<1x256xf32>
    %23 = vector.broadcast %22 : vector<1x256xf32> to vector<32x256xf32>
    %24 = arith.subf %20, %23 : vector<32x256xf32>
    %25 = math.exp %24 : vector<32x256xf32>
    %cst_11 = arith.constant dense<0.000000e+00> : vector<256xf32>
    %26 = vector.multi_reduction <add>, %25, %cst_11 [0] : vector<32x256xf32> to vector<256xf32>
    %27 = vector.shape_cast %26 : vector<256xf32> to vector<1x256xf32>
    %28 = tpu.reciprocal %27 {approx = true} : vector<1x256xf32> -> vector<1x256xf32>
    %cst_12 = arith.constant 0.176776692 : f32
    %29 = vector.broadcast %cst_12 : f32 to vector<1x256xf32>
    %30 = arith.mulf %28, %29 : vector<1x256xf32>
    %31 = vector.broadcast %30 : vector<1x256xf32> to vector<32x256xf32>
    %32 = arith.mulf %25, %31 : vector<32x256xf32>
    %33 = vector.extract_strided_slice %19 {offsets = [0, 0], sizes = [32, 256], strides = [1, 1]} : vector<128x256xf32> to vector<32x256xf32>
    %34 = vector.extract_strided_slice %8 {offsets = [256, 0], sizes = [32, 256], strides = [1, 1]} : vector<384x256xf32> to vector<32x256xf32>
    %cst_13 = arith.constant dense<0.000000e+00> : vector<32x32xf32>
    %35 = tpu.matmul %33, %34, %cst_13 {dimension_numbers = #tpu.dot_dimension_numbers<[1], [1], [0], [0], [0, 0, 1, 0], [], []>} : vector<32x256xf32>, vector<32x256xf32>, vector<32x32xf32> -> vector<32x32xf32>
    %36 = vector.extract_strided_slice %1 {offsets = [0, 0], sizes = [4, 32], strides = [1, 1]} : vector<4x128xf32> to vector<4x32xf32>
    %cst_14 = arith.constant dense<0.000000e+00> : vector<4x32xf32>
    %37 = tpu.matmul %36, %35, %cst_14 {dimension_numbers = #tpu.dot_dimension_numbers<[1], [1], [0], [0], [0, 0, 1, 0], [], []>} : vector<4x32xf32>, vector<32x32xf32>, vector<4x32xf32> -> vector<4x32xf32>
    %38 = vector.extract_strided_slice %8 {offsets = [32, 0], sizes = [32, 256], strides = [1, 1]} : vector<384x256xf32> to vector<32x256xf32>
    %cst_15 = arith.constant dense<0xFF800000> : vector<256xf32>
    %39 = vector.multi_reduction <maximumf>, %38, %cst_15 [0] : vector<32x256xf32> to vector<256xf32>
    %40 = vector.shape_cast %39 : vector<256xf32> to vector<1x256xf32>
    %41 = vector.broadcast %40 : vector<1x256xf32> to vector<32x256xf32>
    %42 = arith.subf %38, %41 : vector<32x256xf32>
    %43 = math.exp %42 : vector<32x256xf32>
    %cst_16 = arith.constant dense<0.000000e+00> : vector<256xf32>
    %44 = vector.multi_reduction <add>, %43, %cst_16 [0] : vector<32x256xf32> to vector<256xf32>
    %45 = vector.shape_cast %44 : vector<256xf32> to vector<1x256xf32>
    %46 = tpu.reciprocal %45 {approx = true} : vector<1x256xf32> -> vector<1x256xf32>
    %cst_17 = arith.constant 0.176776692 : f32
    %47 = vector.broadcast %cst_17 : f32 to vector<1x256xf32>
    %48 = arith.mulf %46, %47 : vector<1x256xf32>
    %49 = vector.broadcast %48 : vector<1x256xf32> to vector<32x256xf32>
    %50 = arith.mulf %43, %49 : vector<32x256xf32>
    %51 = vector.extract_strided_slice %19 {offsets = [32, 0], sizes = [32, 256], strides = [1, 1]} : vector<128x256xf32> to vector<32x256xf32>
    %52 = vector.extract_strided_slice %8 {offsets = [288, 0], sizes = [32, 256], strides = [1, 1]} : vector<384x256xf32> to vector<32x256xf32>
    %cst_18 = arith.constant dense<0.000000e+00> : vector<32x32xf32>
    %53 = tpu.matmul %51, %52, %cst_18 {dimension_numbers = #tpu.dot_dimension_numbers<[1], [1], [0], [0], [0, 0, 1, 0], [], []>} : vector<32x256xf32>, vector<32x256xf32>, vector<32x32xf32> -> vector<32x32xf32>
    %54 = vector.extract_strided_slice %1 {offsets = [0, 32], sizes = [4, 32], strides = [1, 1]} : vector<4x128xf32> to vector<4x32xf32>
    %cst_19 = arith.constant dense<0.000000e+00> : vector<4x32xf32>
    %55 = tpu.matmul %54, %53, %cst_19 {dimension_numbers = #tpu.dot_dimension_numbers<[1], [1], [0], [0], [0, 0, 1, 0], [], []>} : vector<4x32xf32>, vector<32x32xf32>, vector<4x32xf32> -> vector<4x32xf32>
    %56 = vector.extract_strided_slice %8 {offsets = [64, 0], sizes = [32, 256], strides = [1, 1]} : vector<384x256xf32> to vector<32x256xf32>
    %cst_20 = arith.constant dense<0xFF800000> : vector<256xf32>
    %57 = vector.multi_reduction <maximumf>, %56, %cst_20 [0] : vector<32x256xf32> to vector<256xf32>
    %58 = vector.shape_cast %57 : vector<256xf32> to vector<1x256xf32>
    %59 = vector.broadcast %58 : vector<1x256xf32> to vector<32x256xf32>
    %60 = arith.subf %56, %59 : vector<32x256xf32>
    %61 = math.exp %60 : vector<32x256xf32>
    %cst_21 = arith.constant dense<0.000000e+00> : vector<256xf32>
    %62 = vector.multi_reduction <add>, %61, %cst_21 [0] : vector<32x256xf32> to vector<256xf32>
    %63 = vector.shape_cast %62 : vector<256xf32> to vector<1x256xf32>
    %64 = tpu.reciprocal %63 {approx = true} : vector<1x256xf32> -> vector<1x256xf32>
    %cst_22 = arith.constant 0.176776692 : f32
    %65 = vector.broadcast %cst_22 : f32 to vector<1x256xf32>
    %66 = arith.mulf %64, %65 : vector<1x256xf32>
    %67 = vector.broadcast %66 : vector<1x256xf32> to vector<32x256xf32>
    %68 = arith.mulf %61, %67 : vector<32x256xf32>
    %69 = vector.extract_strided_slice %19 {offsets = [64, 0], sizes = [32, 256], strides = [1, 1]} : vector<128x256xf32> to vector<32x256xf32>
    %70 = vector.extract_strided_slice %8 {offsets = [320, 0], sizes = [32, 256], strides = [1, 1]} : vector<384x256xf32> to vector<32x256xf32>
    %cst_23 = arith.constant dense<0.000000e+00> : vector<32x32xf32>
    %71 = tpu.matmul %69, %70, %cst_23 {dimension_numbers = #tpu.dot_dimension_numbers<[1], [1], [0], [0], [0, 0, 1, 0], [], []>} : vector<32x256xf32>, vector<32x256xf32>, vector<32x32xf32> -> vector<32x32xf32>
    %72 = vector.extract_strided_slice %1 {offsets = [0, 64], sizes = [4, 32], strides = [1, 1]} : vector<4x128xf32> to vector<4x32xf32>
    %cst_24 = arith.constant dense<0.000000e+00> : vector<4x32xf32>
    %73 = tpu.matmul %72, %71, %cst_24 {dimension_numbers = #tpu.dot_dimension_numbers<[1], [1], [0], [0], [0, 0, 1, 0], [], []>} : vector<4x32xf32>, vector<32x32xf32>, vector<4x32xf32> -> vector<4x32xf32>
    %74 = vector.extract_strided_slice %8 {offsets = [96, 0], sizes = [32, 256], strides = [1, 1]} : vector<384x256xf32> to vector<32x256xf32>
    %cst_25 = arith.constant dense<0xFF800000> : vector<256xf32>
    %75 = vector.multi_reduction <maximumf>, %74, %cst_25 [0] : vector<32x256xf32> to vector<256xf32>
    %76 = vector.shape_cast %75 : vector<256xf32> to vector<1x256xf32>
    %77 = vector.broadcast %76 : vector<1x256xf32> to vector<32x256xf32>
    %78 = arith.subf %74, %77 : vector<32x256xf32>
    %79 = math.exp %78 : vector<32x256xf32>
    %cst_26 = arith.constant dense<0.000000e+00> : vector<256xf32>
    %80 = vector.multi_reduction <add>, %79, %cst_26 [0] : vector<32x256xf32> to vector<256xf32>
    %81 = vector.shape_cast %80 : vector<256xf32> to vector<1x256xf32>
    %82 = tpu.reciprocal %81 {approx = true} : vector<1x256xf32> -> vector<1x256xf32>
    %cst_27 = arith.constant 0.176776692 : f32
    %83 = vector.broadcast %cst_27 : f32 to vector<1x256xf32>
    %84 = arith.mulf %82, %83 : vector<1x256xf32>
    %85 = vector.broadcast %84 : vector<1x256xf32> to vector<32x256xf32>
    %86 = arith.mulf %79, %85 : vector<32x256xf32>
    %87 = vector.extract_strided_slice %19 {offsets = [96, 0], sizes = [32, 256], strides = [1, 1]} : vector<128x256xf32> to vector<32x256xf32>
    %88 = vector.extract_strided_slice %8 {offsets = [352, 0], sizes = [32, 256], strides = [1, 1]} : vector<384x256xf32> to vector<32x256xf32>
    %cst_28 = arith.constant dense<0.000000e+00> : vector<32x32xf32>
    %89 = tpu.matmul %87, %88, %cst_28 {dimension_numbers = #tpu.dot_dimension_numbers<[1], [1], [0], [0], [0, 0, 1, 0], [], []>} : vector<32x256xf32>, vector<32x256xf32>, vector<32x32xf32> -> vector<32x32xf32>
    %90 = vector.extract_strided_slice %1 {offsets = [0, 96], sizes = [4, 32], strides = [1, 1]} : vector<4x128xf32> to vector<4x32xf32>
    %cst_29 = arith.constant dense<0.000000e+00> : vector<4x32xf32>
    %91 = tpu.matmul %90, %89, %cst_29 {dimension_numbers = #tpu.dot_dimension_numbers<[1], [1], [0], [0], [0, 0, 1, 0], [], []>} : vector<4x32xf32>, vector<32x32xf32>, vector<4x32xf32> -> vector<4x32xf32>
    %92 = tpu.concatenate %32, %50, %68, %86 in 0 : vector<32x256xf32>, vector<32x256xf32>, vector<32x256xf32>, vector<32x256xf32> -> vector<128x256xf32>
    %93 = tpu.concatenate %37, %55, %73, %91 in 1 : vector<4x32xf32>, vector<4x32xf32>, vector<4x32xf32>, vector<4x32xf32> -> vector<4x128xf32>
    %cst_30 = arith.constant dense<0.000000e+00> : vector<4x256xf32>
    %94 = tpu.matmul %93, %92, %cst_30 {dimension_numbers = #tpu.dot_dimension_numbers<[1], [0], [0], [1], [0, 0, 1, 1], [], []>} : vector<4x128xf32>, vector<128x256xf32>, vector<4x256xf32> -> vector<4x256xf32>
    %95 = vector.broadcast %3 : vector<4x1xf32> to vector<4x256xf32>
    %96 = arith.addf %94, %95 : vector<4x256xf32>
    %97 = vector.shape_cast %96 : vector<4x256xf32> to vector<1x4x256xf32>
    %cst_31 = arith.constant dense<0.000000e+00> : vector<1xf32>
    %98 = vector.multi_reduction <add>, %97, %cst_31 [1, 2] : vector<1x4x256xf32> to vector<1xf32>
    %99 = vector.shape_cast %98 : vector<1xf32> to vector<1x1x1xf32>
    %100 = vector.extract %99[0, 0, 0] : f32 from vector<1x1x1xf32>
    %101 = arith.mulf %96, %96 : vector<4x256xf32>
    %102 = vector.shape_cast %101 : vector<4x256xf32> to vector<1x4x256xf32>
    %cst_32 = arith.constant dense<0.000000e+00> : vector<1xf32>
    %103 = vector.multi_reduction <add>, %102, %cst_32 [1, 2] : vector<1x4x256xf32> to vector<1xf32>
    %104 = vector.shape_cast %103 : vector<1xf32> to vector<1x1x1xf32>
    %105 = vector.extract %104[0, 0, 0] : f32 from vector<1x1x1xf32>
    %cst_33 = arith.constant 9.765625E-4 : f32
    %106 = arith.mulf %100, %cst_33 : f32
    %cst_34 = arith.constant 9.765625E-4 : f32
    %107 = arith.mulf %105, %cst_34 : f32
    %108 = arith.mulf %106, %106 : f32
    %109 = arith.subf %107, %108 : f32
    %110 = vector.broadcast %106 : f32 to vector<4x256xf32>
    %111 = arith.subf %96, %110 : vector<4x256xf32>
    %cst_35 = arith.constant 9.99999974E-6 : f32
    %112 = arith.addf %109, %cst_35 : f32
    %113 = math.rsqrt %112 : f32
    %114 = vector.broadcast %113 : f32 to vector<4x256xf32>
    %115 = arith.mulf %111, %114 : vector<4x256xf32>
    %116 = vector.broadcast %4 : vector<4x1xf32> to vector<4x256xf32>
    %117 = arith.mulf %115, %116 : vector<4x256xf32>
    %118 = vector.broadcast %5 : vector<4x1xf32> to vector<4x256xf32>
    %119 = arith.addf %117, %118 : vector<4x256xf32>
    %c0_36 = arith.constant 0 : index
    %c0_37 = arith.constant 0 : index
    %c0_38 = arith.constant 0 : index
    %120 = vector.load %arg5[%c0_36, %c0_37, %c0_38] : memref<1x4x256xf32, #tpu.memory_space<vmem>>, vector<1x4x256xf32>
    %121 = vector.shape_cast %120 : vector<1x4x256xf32> to vector<4x256xf32>
    %122 = vector.shape_cast %119 : vector<4x256xf32> to vector<1x4x256xf32>
    tpu.vector_store %arg5[%c0_36, %c0_37, %c0_38], %122 {strides = array<i32>} : memref<1x4x256xf32, #tpu.memory_space<vmem>>, vector<1x4x256xf32>,
    return
  }
  func.func @transform_0(%arg0: i32) -> (i32, i32, i32) {
    %c0_i32 = arith.constant 0 : i32
    %c0_i32_0 = arith.constant 0 : i32
    %c0_i32_1 = arith.constant 0 : i32
    return %arg0, %c0_i32, %c0_i32_0 : i32, i32, i32
  }
  func.func @transform_1(%arg0: i32) -> (i32, i32) {
    %c0_i32 = arith.constant 0 : i32
    %c0_i32_0 = arith.constant 0 : i32
    %c0_i32_1 = arith.constant 0 : i32
    return %c0_i32, %c0_i32_0 : i32, i32
  }
  func.func @transform_2(%arg0: i32) -> (i32, i32) {
    %c0_i32 = arith.constant 0 : i32
    %c0_i32_0 = arith.constant 0 : i32
    %c0_i32_1 = arith.constant 0 : i32
    return %c0_i32, %c0_i32_0 : i32, i32
  }
  func.func @transform_3(%arg0: i32) -> (i32, i32) {
    %c0_i32 = arith.constant 0 : i32
    %c0_i32_0 = arith.constant 0 : i32
    %c0_i32_1 = arith.constant 0 : i32
    return %c0_i32, %c0_i32_0 : i32, i32
  }
  func.func @transform_4(%arg0: i32) -> (i32, i32, i32) {
    %c0_i32 = arith.constant 0 : i32
    %c0_i32_0 = arith.constant 0 : i32
    %c0_i32_1 = arith.constant 0 : i32
    return %arg0, %c0_i32, %c0_i32_0 : i32, i32, i32
  }
}

</mosaic_0001>

<bundles_post_ra>
// kernel: tpu_custom_call.1
= control target key start
LH: loop header
LB: loop body
LE: loop exit
PB: predicated region body
PF: predicated region fallthrough
CT: control target
= control target key end

     0   :  { %9 = vsyncpa [#allocation3], 0  ;;  %s4151_s0 = inlined_call_operand.hbm [shape: f32[2,4,256], index: 0, kind: input, shape index: {}]   ;;  %s4152_s1 = inlined_call_operand.hbm [shape: f32[4,384], index: 1, kind: input, shape index: {}]   ;;  %s4153_s2 = inlined_call_operand.vmem [shape: f32[4,128], index: 2, kind: input, shape index: {}]   ;;  %s4154_s3 = inlined_call_operand.vmem [shape: f32[4,3], index: 3, kind: input, shape index: {}]   ;;  %s4155_s4 = inlined_call_operand.hbm [shape: f32[2,4,256], index: 4, kind: output, shape index: {}]  }
   0x1   :  { %11 = vsyncpa [#allocation3 + $0x1], 0 }
   0x2   :  { %12 = vsyncpa [#allocation6], 0 }
   0x3   :  { %13 = vsyncpa [#allocation4], 0 }
   0x4   :  { %15 = vsyncpa [#allocation4 + $0x1], 0  ;;  %s2966_s15 = smov 0   ;;  %s2968_s16 = smov 0  }
   0x5   :  { %s2970_s17 = smov 0   ;;  %s2972_s18 = smov 0  }
   0x6 LB: > { %s2987_s19 = sadd.s32 4294967295, %s2927_s18   ;;  %s2293_s20 = sadd.s32 4294967294, %s2927_s18   ;;  %s2927_s18 = sphi %s2972_s18, %s4334_s18   ;;  %s2923_s17 = sphi %s2970_s17, %s4333_s17   ;;  %s2919_s16 = sphi %s2968_s16, %s4332_s16   ;;  %s2915_s15 = sphi %s2966_s15, %s4331_s15  }
   0x7   : > { %p41_p0 = scmp.ne.s32.totalorder %s2919_s16, %s2915_s15  ;;  %p4156_p1 = scmp.eq.s32.totalorder %s2987_s19, 0 }
   0x8   : > { %p134_p3 = scmp.eq.s32.totalorder %s2293_s20, 1  ;;  %p2294_p5 = scmp.ge.s32.totalorder %s2927_s18, 1 }
   0x9   : > { %p2996_p4 = por %p4156_p1, %p41_p0  ;;  %p141_p7 = scmp.lt.s32.totalorder %s2927_s18, 3 }
   0xa   : > { %p3001_p6 = por %p134_p3, %p41_p0  ;;  %s2929_s24 = smov [#allocation5]  }
   0xb   : > { %s4198_s21 = scalar_select %p2996_p4, 1, 0 }
   0xc   : > { %s4199_s22 = scalar_select %p3001_p6, 1, 0 }
   0xd   : > { %p3006_p8 = pnand %p2294_p5, %p141_p7  ;;  %s154_s25 = sshll.u32 %s2929_s24, 4  ;;  %s155_s25 = int_to_ptr.vmem [resolvable:$true] %s154_s25 }
   0xe   : > { %s3014_s26 = sadd.s32 1, %s2927_s18   ;;  %s28_s30 = sadd.s32 1, %s2923_s17 }
   0xf   : > { %s4200_s23 = scalar_select %p3006_p8, 1, 0 }
  0x10   : > { %p2557_p10 = pneg %p3006_p8  ;;  %s25_s28 = ssub.s32 %s2927_s18, %s3014_s26 }
  0x11   : > { %p3024_p12 = scmp.eq.s32.totalorder %s25_s28, 0  ;;  %s2799_s7 = scalar_lea.hbm %s4152_s1, 192 }
  0x12   : > { %p3018_p11 = pnand %p2557_p10, %p4156_p1  ;;  %p2800_p0 = scmp.ne.s32.totalorder %s4152_s1, %s2799_s7 }
  0x13   : > { %s4202_s29 = scalar_select %p3024_p12, 1, 0 }
  0x14   : > { %p2801_p3 = pneg %p3018_p11  ;;  %p2806_p10 = scmp.lt.u32.totalorder %s2799_s7, %s4152_s1 }
  0x16   : > { %p2802_p5 = pnand %p2801_p3, %p2800_p0 }
  0x18   : > { %p2803_p7 = pneg %p2802_p5 }
  0x1a   : > { %p2808_p9 = pnand %p2806_p10, %p2803_p7 }
  0x1c   : > { %2811 = shalt.err (!%p2808_p9)
}
  0x1d   : > { %s2812_s12 = scalar_lea.vmem %s155_s25, 192  ;;  %p2820_p6 = scmp.lt.s32.totalorder %s155_s25, %s155_s25 }
  0x1e   : > { %p2813_p1 = scmp.ne.s32.totalorder %s155_s25, %s2812_s12  ;;  %p2821_p4 = scmp.lt.s32.totalorder %s2812_s12, %s2812_s12 }
  0x20   : > { %p2815_p2 = pnand %p2813_p1, %p2801_p3  ;;  %p2822_p8 = por %p2821_p4, %p2820_p6 }
  0x22   : > { %p2816_p13 = pneg %p2815_p2 }
  0x24   : > { %p2823_p12 = pnand %p2822_p8, %p2816_p13 }
  0x26   : > { %2826 = shalt.err (!%p2823_p12)
}
  0x27   : > { %2560 = dma.hbm_to_vmem [thread:$0]  (!%p3018_p11), %s4152_s1, 192, %s155_s25, [#allocation6]  }
  0x28   : > { %p4203_p1 = scmp.ne.s32.totalorder %s4202_s29, 0  ;;  %p36_p2 = scmp.eq.s32.totalorder %s2927_s18, 0 }
  0x29   : > { %p4204_p4 = scmp.ne.s32.totalorder %s2923_s17, %s2919_s16  ;;  %p4205_p6 = scmp.eq.s32.totalorder %s2987_s19, 1 }
  0x2a   : > { %s3050_s20 = scalar_select %p4203_p1, %s2923_s17, %s28_s30  }
  0x2b   : > { %p3058_p8 = por %p4205_p6, %p4204_p4  ;;  %p2570_p9 = scmp.lt.s32.totalorder %s2927_s18, 2 }
  0x2c   : > { %s171_s27 = sand.u32 1, %s2923_s17   ;;  %p4207_p12 = pmov %p4204_p4 }
  0x2d   : > { %s2297_s28 = sshll.u32 %s171_s27, 3  ;;  %s2379_s5 = sshll.u32 %s2927_s18, 7 }
  0x2e   : > { %p37_p13 = por %p36_p2, %p4207_p12  ;;  %s3071_s25 = scalar_lea.hbm %s4151_s0, %s2379_s5 }
  0x2f   : > { %s175_s29 = scalar_lea.vmem [#allocation2], %s2297_s28  ;;  %s172_s9 = scalar_lea.sflag [#allocation3], %s171_s27 }
  0x30   : > { %s183_s30 = sshll.u32 %s175_s29, 4  ;;  %p3073_p11 = pnand %p2570_p9, %p37_p13  ;;  %s3077_s30 = int_to_ptr.vmem [resolvable:$true] %s183_s30 }
  0x31   : > { %s2827_s10 = scalar_lea.hbm %s3071_s25, 128  ;;  %s2832_s13 = scalar_lea.hbm %s4151_s0, 256 }
  0x32   : > { %p2828_p0 = scmp.ne.s32.totalorder %s3071_s25, %s2827_s10  ;;  %p2829_p3 = pneg %p3073_p11 }
  0x33   : > { %p2833_p10 = scmp.lt.u32.totalorder %s3071_s25, %s4151_s0  ;;  %p2834_p1 = scmp.lt.u32.totalorder %s2832_s13, %s2827_s10 }
  0x34   : > { %p2830_p5 = pnand %p2829_p3, %p2828_p0  ;;  %p2836_p4 = scmp.lt.u32.totalorder %s2827_s10, %s3071_s25 }
  0x35   : > { %p2835_p2 = por %p2834_p1, %p2833_p10 }
  0x36   : > { %p2831_p7 = pneg %p2830_p5 }
  0x37   : > { %p2837_p6 = por %p2836_p4, %p2835_p2 }
  0x39   : > { %p2838_p9 = pnand %p2837_p6, %p2831_p7 }
  0x3b   : > { %2841 = shalt.err (!%p2838_p9)
}
  0x3c   : > { %s2842_s27 = scalar_lea.vmem %s3077_s30, 128  ;;  %s2930_s5 = smov [#allocation2]  }
  0x3d   : > { %p2843_p12 = scmp.ne.s32.totalorder %s3077_s30, %s2842_s27  ;;  %s2847_s6 = sshll.u32 %s2930_s5, 4  ;;  %s2848_s6 = int_to_ptr.vmem [resolvable:$false] %s2847_s6 }
  0x3e   : > { %s2849_s7 = scalar_lea.vmem %s2848_s6, 256  ;;  %p2850_p5 = scmp.lt.s32.totalorder %s3077_s30, %s2848_s6 }
  0x3f   : > { %p2845_p13 = pnand %p2843_p12, %p2829_p3  ;;  %p2851_p10 = scmp.lt.s32.totalorder %s2849_s7, %s2842_s27 }
  0x41   : > { %p2846_p0 = pneg %p2845_p13  ;;  %p2852_p1 = por %p2851_p10, %p2850_p5 }
  0x43   : > { %p2853_p2 = pnand %p2852_p1, %p2846_p0 }
  0x45   : > { %2856 = shalt.err (!%p2853_p2)
}
  0x46   : > { %2564 = dma.hbm_to_vmem [thread:$0]  (!%p3073_p11), %s3071_s25, 128, %s3077_s30, %s172_s9  }
  0x47   : > { %p4209_p7 = scmp.ne.s32.totalorder %s4200_s23, 0 }
  0x49   : > { %192 = sbr.rel (%p4209_p7) target bundleno = 2643 (0xa53), region = 36 }
  0x50   : > { %s3107_s29 = sand.u32 1, %s2919_s16   ;;  %p4210_p3 = scmp.ne.s32.totalorder %s4198_s21, 0 }
  0x51   : > { %s2301_s10 = sshll.u32 %s3107_s29, 3  ;;  %s195_s11 = scalar_lea.sflag [#allocation3], %s3107_s29 }
  0x52   : > { %s198_s12 = scalar_lea.vmem [#allocation2], %s2301_s10 }
  0x53   : > { %2902 = dma.done.wait (%p4210_p3), %s195_s11, 128  }
  0x54   : > { %2904 = vsyncadd (%p4210_p3), %s195_s11, 4294967168  ;;  %p4211_p11 = scmp.eq.s32.totalorder %s2987_s19, 0 }
  0x56   : > { %2906 = dma.done.wait (%p4211_p11), [#allocation6], 192   ;;  %p4212_p4 = pmov %p4211_p11 }
  0x57   : > { %v4159_v0 = vmov 0.0   ;;  %v227_v1 = vld [vmem:[#allocation5] sm:$0xff]  ;;  %v231_v2 = vld [vmem:[%s198_s12] sm:$0xff]  ;;  %vm478_vm0 = vcmask 1043456   ;;  %v228_v5 = vld [vmem:[#allocation5 + $0x8] sm:$0xf] }
  0x58   : > { %2908 = vsyncadd (%p4212_p4), [#allocation6], 4294967104  ;;  %547 = vmatprep.mubr.f32.mxu0 %v4159_v0  ;;  %805 = vmatprep.mubr.f32.mxu1 %v4159_v0  ;;  %v332_v3 = vcombine.high %v231_v2, %v231_v2  ;;  %v233_v4 = vcombine.high %v227_v1, %v227_v1  ;;  %vm333_vm1 = vcmask 31744   ;;  %vm2933_vm2 = vmmov 0   ;;  %s2934_s25 = smov 96   ;;  %s2935_s30 = smov 64  }
  0x59   : > { %235 = vxpose.xlu0.b32.start.end [1/1] (short) %v227_v1, 128  ;;  %299 = vxpose.xlu1.b32.start.end [1/1] (short) %v228_v5, 128  ;;  %vm1233_vm3 = vcmask 261120   ;;  %s2936_s8 = smov 32   ;;  %vm2061_vm5 = vcmask 523264   ;;  %vm2063_vm6 = vcmask 785408   ;;  %s2380_s21 = sshll.u32 %s2987_s19, 7 }
  0x5a   : > { %2304 = vmatprep.subr.msk.mxu0 %vm478_vm0, %v332_v3  ;;  %2541 = vmatprep.subr.msk.mxu1 %vm478_vm0, %v332_v3  ;;  %vm3884_vm4 = vmpackc.low %vm1233_vm3, %vm1233_vm3  ;;  %s226_s23 = scalar_lea.vmem [#allocation7], %s2301_s10  ;;  %s4107_s9 = scalar_lea.hbm %s4155_s4, %s2380_s21 }
  0x5b   : > { %2305 = vmatpush1.msk.msra.mxu0 %vm478_vm0, %v231_v2  ;;  %2542 = vmatpush1.msk.msra.mxu1 %vm478_vm0, %v231_v2  ;;  %s2199_s13 = scalar_lea.sflag [#allocation4], %s3107_s29  ;;  %s2940_s19 = smov [#allocation7]  }
  0x5c   : > { %s2861_s10 = sshll.u32 %s2940_s19, 4  ;;  %s2862_s10 = int_to_ptr.vmem [resolvable:$false] %s2861_s10 }
  0x96   : > { %267 = vxpose.xlu0.b32.start.end [1/1] (short) %v233_v4, 128 }
  0xd9   : > { %v251_v6 = vpop.trf.xlu0  ;;  %v315_v35 = vpop.trf.xlu1 }
  0xda   : > { %2306 = vmatmul.mubr.msk.f32.vlgmr.msra.gmra.mrb[0].mxu0 %vm333_vm1, %v251_v6 }
  0xdb   : > { %553 = vmatprep.mubr.f32.mxu0 %v4159_v0 }
  0xdd   : > { %v252_v7 = vpop.trf.xlu0  ;;  %v316_v37 = vpop.trf.xlu1 }
  0xde   : > { %2307 = vmatmul.mubr.msk.f32.gmra.mrb[2].mxu0 %vm333_vm1, %v252_v7 }
  0xdf   : > { %559 = vmatprep.mubr.f32.mxu0 %v4159_v0 }
  0xe1   : > { %v253_v8 = vpop.trf.xlu0  ;;  %v317_v39 = vpop.trf.xlu1 }
  0xe2   : > { %2308 = vmatmul.mubr.msk.f32.gmra.mrb[4].mxu0 %vm333_vm1, %v253_v8 }
  0xe3   : > { %565 = vmatprep.mubr.f32.mxu0 %v4159_v0 }
  0xe5   : > { %v254_v9 = vpop.trf.xlu0  ;;  %v318_v41 = vpop.trf.xlu1 }
  0xe6   : > { %2309 = vmatmul.mubr.msk.f32.gmra.mrb[6].mxu0 %vm333_vm1, %v254_v9 }
  0xe7   : > { %571 = vmatprep.mubr.f32.mxu0 %v4159_v0 }
  0xe9   : > { %v255_v10 = vpop.trf.xlu0  ;;  %v319_v44 = vpop.trf.xlu1 }
  0xea   : > { %2310 = vmatmul.mubr.msk.f32.gmra.mrb[8].mxu0 %vm333_vm1, %v255_v10 }
  0xeb   : > { %577 = vmatprep.mubr.f32.mxu0 %v4159_v0 }
  0xed   : > { %v256_v11 = vpop.trf.xlu0  ;;  %v320_v47 = vpop.trf.xlu1 }
  0xee   : > { %2311 = vmatmul.mubr.msk.f32.gmra.mrb[10].mxu0 %vm333_vm1, %v256_v11 }
  0xef   : > { %583 = vmatprep.mubr.f32.mxu0 %v4159_v0 }
  0xf1   : > { %v257_v12 = vpop.trf.xlu0  ;;  %v321_v52 = vpop.trf.xlu1 }
  0xf2   : > { %2312 = vmatmul.mubr.msk.f32.gmra.mrb[12].mxu0 %vm333_vm1, %v257_v12 }
  0xf3   : > { %589 = vmatprep.mubr.f32.mxu0 %v4159_v0 }
  0xf5   : > { %v258_v13 = vpop.trf.xlu0  ;;  %v322_v57 = vpop.trf.xlu1 }
  0xf6   : > { %2313 = vmatmul.mubr.msk.f32.gmra.mrb[14].mxu0 %vm333_vm1, %v258_v13 }
  0xf7   : > { %595 = vmatprep.mubr.f32.mxu0 %v4159_v0 }
  0xf9   : > { %v259_v14 = vpop.trf.xlu0  ;;  %v323_v1 = vpop.trf.xlu1 }
  0xfa   : > { %2314 = vmatmul.mubr.msk.f32.gmra.mrb[16].mxu0 %vm333_vm1, %v259_v14 }
  0xfb   : > { %601 = vmatprep.mubr.f32.mxu0 %v4159_v0 }
  0xfd   : > { %v260_v15 = vpop.trf.xlu0  ;;  %v3227_v8 = vpop.trf.xlu1 }
  0xfe   : > { %2315 = vmatmul.mubr.msk.f32.gmra.mrb[18].mxu0 %vm333_vm1, %v260_v15 }
  0xff   : > { %607 = vmatprep.mubr.f32.mxu0 %v4159_v0 }
 0x101   : > { %v261_v16 = vpop.trf.xlu0 }
 0x102   : > { %2316 = vmatmul.mubr.msk.f32.gmra.mrb[20].mxu0 %vm333_vm1, %v261_v16 }
 0x103   : > { %613 = vmatprep.mubr.f32.mxu0 %v4159_v0 }
 0x105   : > { %v262_v17 = vpop.trf.xlu0 }
 0x106   : > { %2317 = vmatmul.mubr.msk.f32.gmra.mrb[22].mxu0 %vm333_vm1, %v262_v17  ;;  %v3239_v17 = vpop.trf.xlu1 }
 0x107   : > { %619 = vmatprep.mubr.f32.mxu0 %v4159_v0 }
 0x109   : > { %v263_v18 = vpop.trf.xlu0 }
 0x10a   : > { %2318 = vmatmul.mubr.msk.f32.gmra.mrb[24].mxu0 %vm333_vm1, %v263_v18 }
 0x10b   : > { %625 = vmatprep.mubr.f32.mxu0 %v4159_v0 }
 0x10d   : > { %v264_v19 = vpop.trf.xlu0 }
 0x10e   : > { %2319 = vmatmul.mubr.msk.f32.gmra.mrb[26].mxu0 %vm333_vm1, %v264_v19 }
 0x10f   : > { %631 = vmatprep.mubr.f32.mxu0 %v4159_v0 }
 0x111   : > { %v265_v20 = vpop.trf.xlu0 }
 0x112   : > { %2320 = vmatmul.mubr.msk.f32.gmra.mrb[28].mxu0 %vm333_vm1, %v265_v20 }
 0x113   : > { %637 = vmatprep.mubr.f32.mxu0 %v4159_v0 }
 0x115   : > { %v266_v21 = vpop.trf.xlu0 }
 0x116   : > { %2321 = vmatmul.mubr.msk.f32.gmra.mrb[30].mxu0 %vm333_vm1, %v266_v21 }
 0x117   : > { %643 = vmatprep.mubr.f32.mxu0 %v4159_v0 }
 0x119   : > { %v283_v22 = vpop.trf.xlu0 }
 0x11a   : > { %2322 = vmatmul.mubr.msk.f32.gmra.mrb[32].mxu0 %vm333_vm1, %v283_v22 }
 0x11b   : > { %649 = vmatprep.mubr.f32.mxu0 %v4159_v0 }
 0x11d   : > { %v284_v23 = vpop.trf.xlu0 }
 0x11e   : > { %2323 = vmatmul.mubr.msk.f32.gmra.mrb[34].mxu0 %vm333_vm1, %v284_v23 }
 0x11f   : > { %655 = vmatprep.mubr.f32.mxu0 %v4159_v0 }
 0x121   : > { %v285_v24 = vpop.trf.xlu0 }
 0x122   : > { %2324 = vmatmul.mubr.msk.f32.gmra.mrb[36].mxu0 %vm333_vm1, %v285_v24 }
 0x123   : > { %661 = vmatprep.mubr.f32.mxu0 %v4159_v0 }
 0x125   : > { %v286_v25 = vpop.trf.xlu0 }
 0x126   : > { %2325 = vmatmul.mubr.msk.f32.gmra.mrb[38].mxu0 %vm333_vm1, %v286_v25 }
 0x127   : > { %667 = vmatprep.mubr.f32.mxu0 %v4159_v0 }
 0x129   : > { %v287_v26 = vpop.trf.xlu0 }
 0x12a   : > { %2326 = vmatmul.mubr.msk.f32.gmra.mrb[40].mxu0 %vm333_vm1, %v287_v26 }
 0x12b   : > { %673 = vmatprep.mubr.f32.mxu0 %v4159_v0 }
 0x12d   : > { %v288_v27 = vpop.trf.xlu0 }
 0x12e   : > { %2327 = vmatmul.mubr.msk.f32.gmra.mrb[42].mxu0 %vm333_vm1, %v288_v27 }
 0x12f   : > { %679 = vmatprep.mubr.f32.mxu0 %v4159_v0 }
 0x131   : > { %v289_v28 = vpop.trf.xlu0 }
 0x132   : > { %2328 = vmatmul.mubr.msk.f32.gmra.mrb[44].mxu0 %vm333_vm1, %v289_v28 }
 0x133   : > { %685 = vmatprep.mubr.f32.mxu0 %v4159_v0 }
 0x135   : > { %v290_v29 = vpop.trf.xlu0 }
 0x136   : > { %2329 = vmatmul.mubr.msk.f32.gmra.mrb[46].mxu0 %vm333_vm1, %v290_v29 }
 0x137   : > { %691 = vmatprep.mubr.f32.mxu0 %v4159_v0 }
 0x139   : > { %v291_v30 = vpop.trf.xlu0 }
 0x13a   : > { %2330 = vmatmul.mubr.msk.f32.gmra.mrb[48].mxu0 %vm333_vm1, %v291_v30  ;;  %v326_v30 = vpop.trf.xlu1 }
 0x13b   : > { %697 = vmatprep.mubr.f32.mxu0 %v4159_v0  ;;  %2349 = vmatmul.mubr.msk.f32.vlgmr.msra.gmra.mrb[0].mxu1 %vm333_vm1, %v326_v30 }
 0x13c   : > { %811 = vmatprep.mubr.f32.mxu1 %v4159_v0 }
 0x13d   : > { %v292_v31 = vpop.trf.xlu0 }
 0x13e   : > { %2331 = vmatmul.mubr.msk.f32.gmra.mrb[50].mxu0 %vm333_vm1, %v292_v31 }
 0x13f   : > { %703 = vmatprep.mubr.f32.mxu0 %v4159_v0 }
 0x141   : > { %v293_v32 = vpop.trf.xlu0 }
 0x142   : > { %2332 = vmatmul.mubr.msk.f32.gmra.mrb[52].mxu0 %vm333_vm1, %v293_v32 }
 0x143   : > { %709 = vmatprep.mubr.f32.mxu0 %v4159_v0 }
 0x145   : > { %v294_v33 = vpop.trf.xlu0 }
 0x146   : > { %2333 = vmatmul.mubr.msk.f32.gmra.mrb[54].mxu0 %vm333_vm1, %v294_v33 }
 0x147   : > { %715 = vmatprep.mubr.f32.mxu0 %v4159_v0 }
 0x149   : > { %v295_v34 = vpop.trf.xlu0 }
 0x14a   : > { %2334 = vmatmul.mubr.msk.f32.gmra.mrb[56].mxu0 %vm333_vm1, %v295_v34 }
 0x14b   : > { %721 = vmatprep.mubr.f32.mxu0 %v4159_v0 }
 0x14d   : > { %v296_v36 = vpop.trf.xlu0 }
 0x14e   : > { %2335 = vmatmul.mubr.msk.f32.gmra.mrb[58].mxu0 %vm333_vm1, %v296_v36 }
 0x14f   : > { %727 = vmatprep.mubr.f32.mxu0 %v4159_v0 }
 0x151   : > { %v297_v38 = vpop.trf.xlu0 }
 0x152   : > { %2336 = vmatmul.mubr.msk.f32.gmra.mrb[60].mxu0 %vm333_vm1, %v297_v38 }
 0x153   : > { %733 = vmatprep.mubr.f32.mxu0 %v4159_v0 }
 0x155   : > { %v298_v40 = vpop.trf.xlu0 }
 0x156   : > { %2337 = vmatmul.mubr.msk.f32.gmra.mrb[62].mxu0 %vm333_vm1, %v298_v40 }
 0x157   : > { %739 = vmatprep.mubr.f32.mxu0 %v4159_v0 }
 0x15a   : > { %2338 = vmatmul.mubr.msk.f32.gmra.mrb[64].mxu0 %vm333_vm1, %v315_v35 }
 0x15b   : > { %745 = vmatprep.mubr.f32.mxu0 %v4159_v0 }
 0x15e   : > { %2339 = vmatmul.mubr.msk.f32.gmra.mrb[66].mxu0 %vm333_vm1, %v316_v37 }
 0x15f   : > { %751 = vmatprep.mubr.f32.mxu0 %v4159_v0 }
 0x162   : > { %2340 = vmatmul.mubr.msk.f32.gmra.mrb[68].mxu0 %vm333_vm1, %v317_v39 }
 0x163   : > { %757 = vmatprep.mubr.f32.mxu0 %v4159_v0 }
 0x166   : > { %2341 = vmatmul.mubr.msk.f32.gmra.mrb[70].mxu0 %vm333_vm1, %v318_v41 }
 0x167   : > { %763 = vmatprep.mubr.f32.mxu0 %v4159_v0 }
 0x16a   : > { %2342 = vmatmul.mubr.msk.f32.gmra.mrb[72].mxu0 %vm333_vm1, %v319_v44 }
 0x16b   : > { %769 = vmatprep.mubr.f32.mxu0 %v4159_v0 }
 0x16e   : > { %2343 = vmatmul.mubr.msk.f32.gmra.mrb[74].mxu0 %vm333_vm1, %v320_v47 }
 0x16f   : > { %775 = vmatprep.mubr.f32.mxu0 %v4159_v0 }
 0x172   : > { %2344 = vmatmul.mubr.msk.f32.gmra.mrb[76].mxu0 %vm333_vm1, %v321_v52 }
 0x173   : > { %781 = vmatprep.mubr.f32.mxu0 %v4159_v0 }
 0x176   : > { %2345 = vmatmul.mubr.msk.f32.gmra.mrb[78].mxu0 %vm333_vm1, %v322_v57 }
 0x177   : > { %787 = vmatprep.mubr.f32.mxu0 %v4159_v0 }
 0x17a   : > { %2346 = vmatmul.mubr.msk.f32.gmra.mrb[80].mxu0 %vm333_vm1, %v323_v1 }
 0x17b   : > { %793 = vmatprep.mubr.f32.mxu0 %v4159_v0 }
 0x17e   : > { %2347 = vmatmul.mubr.msk.f32.gmra.mrb[82].mxu0 %vm333_vm1, %v3227_v8 }
 0x17f   : > { %799 = vmatprep.mubr.f32.mxu0 %v4159_v0 }
 0x182   : > { %2348 = vmatmul.mubr.msk.f32.gmra.mrb[84].mxu0 %vm333_vm1, %v3239_v17 }
 0x1ad   : > { %v3190_v42 = vpop.f32.mrb[0].mxu0 }
 0x1ae   : > { %v3193_v43 = vpop.f32.mrb[1].mxu0 }
 0x1b1   : > { %v3196_v45 = vpop.f32.mrb[2].mxu0 }
 0x1b2   : > { %v3199_v46 = vpop.f32.mrb[3].mxu0 }
 0x1b5   : > { %v561_v48 = vpop.f32.mrb[4].mxu0 }
 0x1b6   : > { %v1076_v49 = vmax.f32 %v3190_v42, %v561_v48  ;;  %v3204_v50 = vpop.f32.mrb[5].mxu0 }
 0x1b7   : > { %v1085_v51 = vmax.f32 %v3193_v43, %v3204_v50 }
 0x1b9   : > { %v567_v53 = vpop.f32.mrb[6].mxu0 }
 0x1ba   : > { %v1077_v54 = vmax.f32 %v3196_v45, %v567_v53  ;;  %v3211_v55 = vpop.f32.mrb[7].mxu0 }
 0x1bb   : > { %v1086_v56 = vmax.f32 %v3199_v46, %v3211_v55 }
 0x1bc   : > { %v1078_v58 = vmax.f32 %v1076_v49, %v1077_v54 }
 0x1bd   : > { %v1087_v59 = vmax.f32 %v1085_v51, %v1086_v56  ;;  %v3216_v60 = vpop.f32.mrb[8].mxu0 }
 0x1be   : > { %v1079_v61 = vrot.slane %v1078_v58, 4  ;;  %v3219_v62 = vpop.f32.mrb[9].mxu0 }
 0x1bf   : > { %v1088_v63 = vrot.slane %v1087_v59, 4 }
 0x1c0   : > { %v1080_v2 = vmax.f32 %v1078_v58, %v1079_v61 }
 0x1c1   : > { %v1089_v3 = vmax.f32 %v1087_v59, %v1088_v63  ;;  %v3222_v4 = vpop.f32.mrb[10].mxu0 }
 0x1c2   : > { %v1081_v5 = vrot.slane %v1080_v2, 2  ;;  %v3225_v6 = vpop.f32.mrb[11].mxu0 }
 0x1c3   : > { %v1090_v7 = vrot.slane %v1089_v3, 2 }
 0x1c4   : > { %v1082_v9 = vmax.f32 %v1080_v2, %v1081_v5 }
 0x1c5   : > { %v1091_v10 = vmax.f32 %v1089_v3, %v1090_v7  ;;  %v3230_v11 = vpop.f32.mrb[12].mxu0 }
 0x1c6   : > { %v1083_v12 = vrot.slane %v1082_v9, 1  ;;  %v1319_v13 = vmax.f32 %v3216_v60, %v3230_v11  ;;  %v3235_v14 = vpop.f32.mrb[13].mxu0 }
 0x1c7   : > { %v1092_v15 = vrot.slane %v1091_v10, 1  ;;  %v1328_v16 = vmax.f32 %v3219_v62, %v3235_v14 }
 0x1c8   : > { %v1084_v18 = vmax.f32 %v1082_v9, %v1083_v12 }
 0x1c9   : > { %v1093_v19 = vmax.f32 %v1091_v10, %v1092_v15  ;;  %v3242_v20 = vpop.f32.mrb[14].mxu0 }
 0x1ca   : > { %v1094_v21 = vsub.f32 %v3190_v42, %v1084_v18  ;;  %v1096_v22 = vsub.f32 %v3196_v45, %v1084_v18  ;;  %v1098_v23 = vsub.f32 %v561_v48, %v1084_v18  ;;  %v1100_v24 = vsub.f32 %v567_v53, %v1084_v18  ;;  %v3247_v25 = vpop.f32.mrb[15].mxu0 }
 0x1cb   : > { %v1095_v26 = vsub.f32 %v3193_v43, %v1093_v19  ;;  %v1097_v27 = vsub.f32 %v3199_v46, %v1093_v19  ;;  %v1099_v28 = vsub.f32 %v3204_v50, %v1093_v19  ;;  %v1101_v29 = vsub.f32 %v3211_v55, %v1093_v19  ;;  %v327_v43 = vpop.trf.xlu1 }
 0x1cc   : > { %v1102_v31 = vmul.f32 1.442695, %v1094_v21  ;;  %v1106_v32 = vmul.f32 1.442695, %v1096_v22  ;;  %v1110_v33 = vmul.f32 1.442695, %v1098_v23  ;;  %v1320_v34 = vmax.f32 %v3222_v4, %v3242_v20  ;;  %2350 = vmatmul.mubr.msk.f32.gmra.mrb[2].mxu1 %vm333_vm1, %v327_v43 }
 0x1cd   : > { %v1114_v35 = vmul.f32 1.442695, %v1100_v24  ;;  %v1329_v36 = vmax.f32 %v3225_v6, %v3247_v25  ;;  %v1104_v37 = vmul.f32 1.442695, %v1095_v26  ;;  %v3261_v39 = vpop.f32.mrb[16].mxu0  ;;  %817 = vmatprep.mubr.f32.mxu1 %v4159_v0 }
 0x1ce   : > { %2621 = vpow2.f32 %v1102_v31  ;;  %v1321_v38 = vmax.f32 %v1319_v13, %v1320_v34  ;;  %v1108_v40 = vmul.f32 1.442695, %v1097_v27  ;;  %v3263_v42 = vpop.f32.mrb[17].mxu0  ;;  %v1112_v45 = vmul.f32 1.442695, %v1099_v28 }
 0x1cf   : > { %2623 = vpow2.f32 %v1106_v32  ;;  %v1330_v41 = vmax.f32 %v1328_v16, %v1329_v36  ;;  %v1116_v50 = vmul.f32 1.442695, %v1101_v29  ;;  %v328_v52 = vpop.trf.xlu1 }
 0x1d0   : > { %2625 = vpow2.f32 %v1110_v33  ;;  %v1322_v44 = vrot.slane %v1321_v38, 4  ;;  %2351 = vmatmul.mubr.msk.f32.gmra.mrb[4].mxu1 %vm333_vm1, %v328_v52 }
 0x1d1   : > { %2627 = vpow2.f32 %v1114_v35  ;;  %v1331_v46 = vrot.slane %v1330_v41, 4  ;;  %v3267_v47 = vpop.f32.mrb[18].mxu0  ;;  %823 = vmatprep.mubr.f32.mxu1 %v4159_v0 }
 0x1d2   : > { %2629 = vpow2.f32 %v1104_v37  ;;  %v1323_v48 = vmax.f32 %v1321_v38, %v1322_v44  ;;  %v3271_v49 = vpop.f32.mrb[19].mxu0 }
 0x1d3   : > { %2631 = vpow2.f32 %v1108_v40  ;;  %v1332_v51 = vmax.f32 %v1330_v41, %v1331_v46  ;;  %v329_v63 = vpop.trf.xlu1 }
 0x1d4   : > { %v1324_v53 = vrot.slane %v1323_v48, 2  ;;  %2633 = vpow2.f32 %v1112_v45  ;;  %2352 = vmatmul.mubr.msk.f32.gmra.mrb[6].mxu1 %vm333_vm1, %v329_v63 }
 0x1d5   : > { %v1333_v54 = vrot.slane %v1332_v51, 2  ;;  %v3276_v55 = vpop.f32.mrb[20].mxu0  ;;  %2635 = vpow2.f32 %v1116_v50  ;;  %829 = vmatprep.mubr.f32.mxu1 %v4159_v0 }
 0x1d6   : > { %v1325_v56 = vmax.f32 %v1323_v48, %v1324_v53  ;;  %v1562_v57 = vmax.f32 %v3261_v39, %v3276_v55  ;;  %v3282_v58 = vpop.f32.mrb[21].mxu0 }
 0x1d7   : > { %v1334_v59 = vmax.f32 %v1332_v51, %v1333_v54  ;;  %v1571_v61 = vmax.f32 %v3263_v42, %v3282_v58  ;;  %v330_v18 = vpop.trf.xlu1 }
 0x1d8   : > { %v3286_v1 = vpop.eup %2621  ;;  %v1326_v2 = vrot.slane %v1325_v56, 1  ;;  %2353 = vmatmul.mubr.msk.f32.gmra.mrb[8].mxu1 %vm333_vm1, %v330_v18 }
 0x1d9   : > { %v3291_v3 = vpop.eup %2623  ;;  %v1335_v5 = vrot.slane %v1334_v59, 1  ;;  %v3293_v7 = vpop.f32.mrb[22].mxu0 }
 0x1da   : > { %v3296_v8 = vpop.eup %2625  ;;  %v1118_v9 = vadd.f32 %v3291_v3, %v3286_v1  ;;  %v1327_v10 = vmax.f32 %v1325_v56, %v1326_v2  ;;  %v1563_v12 = vmax.f32 %v3267_v47, %v3293_v7  ;;  %v3302_v13 = vpop.f32.mrb[23].mxu0 }
 0x1db   : > { %v3304_v15 = vpop.eup %2627  ;;  %v1336_v16 = vmax.f32 %v1334_v59, %v1335_v5  ;;  %v1572_v17 = vmax.f32 %v3271_v49, %v3302_v13 }
 0x1dc   : > { %v3308_v19 = vpop.eup %2629  ;;  %v1119_v21 = vadd.f32 %v3296_v8, %v1118_v9  ;;  %v1337_v22 = vsub.f32 %v3216_v60, %v1327_v10  ;;  %v1339_v23 = vsub.f32 %v3222_v4, %v1327_v10  ;;  %v1341_v24 = vsub.f32 %v3230_v11, %v1327_v10 }
 0x1dd   : > { %v3315_v26 = vpop.eup %2631  ;;  %v1343_v27 = vsub.f32 %v3242_v20, %v1327_v10  ;;  %v1338_v28 = vsub.f32 %v3219_v62, %v1336_v16  ;;  %v1340_v29 = vsub.f32 %v3225_v6, %v1336_v16  ;;  %v1342_v30 = vsub.f32 %v3235_v14, %v1336_v16  ;;  %v3321_v31 = vpop.f32.mrb[24].mxu0 }
 0x1de   : > { %v1120_v60 = vadd.f32 %v3304_v15, %v1119_v21  ;;  %v1127_v4 = vadd.f32 %v3315_v26, %v3308_v19  ;;  %v1345_v11 = vmul.f32 1.442695, %v1337_v22  ;;  %v1349_v32 = vmul.f32 1.442695, %v1339_v23  ;;  %v3326_v33 = vpop.f32.mrb[25].mxu0  ;;  %v3328_v34 = vpop.eup %2633 }
 0x1df   : > { %v1353_v20 = vmul.f32 1.442695, %v1341_v24  ;;  %v1357_v35 = vmul.f32 1.442695, %v1343_v27  ;;  %v1344_v62 = vsub.f32 %v3247_v25, %v1336_v16  ;;  %v1347_v36 = vmul.f32 1.442695, %v1338_v28  ;;  %v3332_v37 = vpop.eup %2635 }
 0x1e0   : > { %v1121_v6 = vrot.slane %v1120_v60, 4  ;;  %v1128_v14 = vadd.f32 %v3328_v34, %v1127_v4  ;;  %2637 = vpow2.f32 %v1345_v11  ;;  %v1351_v38 = vmul.f32 1.442695, %v1340_v29 }
 0x1e1   : > { %2639 = vpow2.f32 %v1349_v32  ;;  %v1564_v40 = vmax.f32 %v1562_v57, %v1563_v12  ;;  %v3334_v41 = vpop.f32.mrb[26].mxu0  ;;  %v1573_v45 = vmax.f32 %v1571_v61, %v1572_v17  ;;  %v1355_v25 = vmul.f32 1.442695, %v1342_v30 }
 0x1e2   : > { %v1122_v43 = vadd.f32 %v1121_v6, %v1120_v60  ;;  %v1129_v44 = vadd.f32 %v3332_v37, %v1128_v14  ;;  %2641 = vpow2.f32 %v1353_v20  ;;  %v3337_v46 = vpop.f32.mrb[27].mxu0  ;;  %v1359_v53 = vmul.f32 1.442695, %v1344_v62 }
 0x1e3   : > { %2643 = vpow2.f32 %v1357_v35  ;;  %v1565_v48 = vrot.slane %v1564_v40, 4  ;;  %v1574_v52 = vrot.slane %v1573_v45, 4 }
 0x1e4   : > { %v1123_v50 = vrot.slane %v1122_v43, 2  ;;  %v1130_v51 = vrot.slane %v1129_v44, 4  ;;  %2645 = vpow2.f32 %v1347_v36 }
 0x1e5   : > { %2647 = vpow2.f32 %v1351_v38  ;;  %v1566_v54 = vmax.f32 %v1564_v40, %v1565_v48  ;;  %v3339_v56 = vpop.f32.mrb[28].mxu0  ;;  %v1575_v63 = vmax.f32 %v1573_v45, %v1574_v52 }
 0x1e6   : > { %v1124_v57 = vadd.f32 %v1123_v50, %v1122_v43  ;;  %v1131_v59 = vadd.f32 %v1130_v51, %v1129_v44  ;;  %v3341_v2 = vpop.f32.mrb[29].mxu0  ;;  %2649 = vpow2.f32 %v1355_v25  ;;  %v1805_v5 = vmax.f32 %v3321_v31, %v3339_v56 }
 0x1e7   : > { %v1567_v61 = vrot.slane %v1566_v54, 2  ;;  %v1814_v9 = vmax.f32 %v3326_v33, %v3341_v2  ;;  %v1576_v16 = vrot.slane %v1575_v63, 2  ;;  %2651 = vpow2.f32 %v1359_v53 }
 0x1e8   : > { %v1125_v10 = vrot.slane %v1124_v57, 1  ;;  %v1132_v12 = vrot.slane %v1131_v59, 2 }
 0x1e9   : > { %v1568_v17 = vmax.f32 %v1566_v54, %v1567_v61  ;;  %v3347_v18 = vpop.f32.mrb[30].mxu0  ;;  %v1577_v24 = vmax.f32 %v1575_v63, %v1576_v16 }
 0x1ea   : > { %v3349_v21 = vpop.eup %2637  ;;  %v1126_v22 = vadd.f32 %v1125_v10, %v1124_v57  ;;  %v1133_v23 = vadd.f32 %v1132_v12, %v1131_v59  ;;  %v1806_v27 = vmax.f32 %v3334_v41, %v3347_v18  ;;  %v3353_v28 = vpop.f32.mrb[31].mxu0 }
 0x1eb   : > { %v3355_v29 = vpop.eup %2639  ;;  %v1569_v30 = vrot.slane %v1568_v17, 1  ;;  %v1815_v60 = vmax.f32 %v3337_v46, %v3353_v28  ;;  %v1578_v32 = vrot.slane %v1577_v24, 1 }
 0x1ec   : > { %v3359_v4 = vpop.eup %2641  ;;  %v1361_v11 = vadd.f32 %v3355_v29, %v3349_v21  ;;  %v1807_v20 = vmax.f32 %v1805_v5, %v1806_v27  ;;  %v1134_v35 = vrot.slane %v1133_v23, 1  ;;  %2653 = vrcp.f32 %v1126_v22 }
 0x1ed   : > { %v3363_v62 = vpop.eup %2643  ;;  %v1570_v6 = vmax.f32 %v1568_v17, %v1569_v30  ;;  %v1816_v14 = vmax.f32 %v1814_v9, %v1815_v60  ;;  %v3365_v36 = vpop.f32.mrb[32].mxu0  ;;  %v1579_v43 = vmax.f32 %v1577_v24, %v1578_v32 }
 0x1ee   : > { %v3367_v38 = vpop.eup %2645  ;;  %v1362_v40 = vadd.f32 %v3359_v4, %v1361_v11  ;;  %v1808_v44 = vrot.slane %v1807_v20, 4  ;;  %v3370_v45 = vpop.f32.mrb[33].mxu0  ;;  %v3372_v25 = vadd.f32 %v1134_v35, %v1133_v23 }
 0x1ef   : > { %v3374_v48 = vpop.eup %2647  ;;  %v1580_v50 = vsub.f32 %v3261_v39, %v1570_v6  ;;  %v1582_v51 = vsub.f32 %v3267_v47, %v1570_v6  ;;  %v1584_v52 = vsub.f32 %v3276_v55, %v1570_v6  ;;  %v1586_v53 = vsub.f32 %v3293_v7, %v1570_v6 }
 0x1f0   : > { %v1363_v54 = vadd.f32 %v3363_v62, %v1362_v40  ;;  %v1370_v57 = vadd.f32 %v3374_v48, %v3367_v38  ;;  %v1581_v59 = vsub.f32 %v3263_v42, %v1579_v43  ;;  %v1583_v63 = vsub.f32 %v3271_v49, %v1579_v43  ;;  %v3385_v61 = vpop.eup %2649 }
 0x1f1   : > { %v1588_v5 = vmul.f32 1.442695, %v1580_v50  ;;  %v1592_v9 = vmul.f32 1.442695, %v1582_v51  ;;  %v1596_v39 = vmul.f32 1.442695, %v1584_v52  ;;  %v1585_v47 = vsub.f32 %v3282_v58, %v1579_v43  ;;  %v3392_v17 = vpop.eup %2651 }
 0x1f2   : > { %v1364_v10 = vrot.slane %v1363_v54, 4  ;;  %v1371_v55 = vadd.f32 %v3385_v61, %v1370_v57  ;;  %v1600_v7 = vmul.f32 1.442695, %v1586_v53  ;;  %v1587_v12 = vsub.f32 %v3302_v13, %v1579_v43  ;;  %v3390_v16 = vpop.f32.mrb[34].mxu0 }
 0x1f3   : > { %2655 = vpow2.f32 %v1588_v5  ;;  %v1590_v42 = vmul.f32 1.442695, %v1581_v59  ;;  %v1594_v49 = vmul.f32 1.442695, %v1583_v63  ;;  %v1598_v22 = vmul.f32 1.442695, %v1585_v47 }
 0x1f4   : > { %v1365_v23 = vadd.f32 %v1364_v10, %v1363_v54  ;;  %v1372_v24 = vadd.f32 %v3392_v17, %v1371_v55  ;;  %2657 = vpow2.f32 %v1592_v9  ;;  %v1602_v27 = vmul.f32 1.442695, %v1587_v12  ;;  %v3395_v58 = vpop.f32.mrb[35].mxu0 }
 0x1f5   : > { %2659 = vpow2.f32 %v1596_v39  ;;  %v1809_v30 = vmax.f32 %v1807_v20, %v1808_v44  ;;  %v1817_v60 = vrot.slane %v1816_v14, 4  ;;  %v836_v13 = vmax.f32 %v3365_v36, %v3370_v45  ;;  %v3399_v11 = vpop.f32.mrb[36].mxu0 }
 0x1f6   : > { %v1366_v32 = vrot.slane %v1365_v23, 2  ;;  %v1373_v35 = vrot.slane %v1372_v24, 4  ;;  %2661 = vpow2.f32 %v1600_v7  ;;  %v839_v6 = vmax.f32 %v3390_v16, %v3395_v58  ;;  %v3403_v40 = vpop.f32.mrb[37].mxu0  ;;  %v2654_v43 = vpop.eup %2653 }
 0x1f7   : > { %2663 = vpow2.f32 %v1590_v42  ;;  %v1810_v50 = vrot.slane %v1809_v30, 2  ;;  %v1818_v51 = vmax.f32 %v1816_v14, %v1817_v60  ;;  %837 = vmax.xlane.f32.xlu1 %v836_v13  ;;  %v842_v20 = vmax.f32 %v3399_v11, %v3403_v40 }
 0x1f8   : > { %v1367_v44 = vadd.f32 %v1366_v32, %v1365_v23  ;;  %v1374_v52 = vadd.f32 %v1373_v35, %v1372_v24  ;;  %2665 = vpow2.f32 %v1594_v49  ;;  %840 = vmax.xlane.f32.xlu0 %v839_v6  ;;  %v1138_v53 = vmul.f32 0.17677669, %v2654_v43 }
 0x1f9   : > { %2667 = vpow2.f32 %v1598_v22  ;;  %v1811_v54 = vmax.f32 %v1809_v30, %v1810_v50  ;;  %v1819_v57 = vrot.slane %v1818_v51, 2  ;;  %v3407_v59 = vpop.f32.mrb[38].mxu0 }
 0x1fa   : > { %v1368_v63 = vrot.slane %v1367_v44, 1  ;;  %v1375_v5 = vrot.slane %v1374_v52, 2  ;;  %2669 = vpow2.f32 %v1602_v27  ;;  %v3409_v9 = vpop.f32.mrb[39].mxu0  ;;  %v3412_v14 = vmul.f32 %v3286_v1, %v1138_v53 }
 0x1fb   : > { %v1812_v39 = vrot.slane %v1811_v54, 1  ;;  %v1820_v47 = vmax.f32 %v1818_v51, %v1819_v57  ;;  %843 = vmax.xlane.f32.xlu1 %v842_v20  ;;  %v845_v10 = vmax.f32 %v3407_v59, %v3409_v9  ;;  %2671 = vrcp.f32 %v3372_v25 }
 0x1fc   : > { %4213 = vst [vmem:[#allocation11_spill] sm:$0xff] %v3412_v14  ;;  %v1369_v55 = vadd.f32 %v1368_v63, %v1367_v44  ;;  %v1376_v7 = vadd.f32 %v1375_v5, %v1374_v52  ;;  %v3418_v12 = vmul.f32 %v3291_v3, %v1138_v53  ;;  %v3421_v42 = vmul.f32 %v3296_v8, %v1138_v53 }
 0x1fd   : > { %v3423_v49 = vpop.eup %2655  ;;  %v1813_v1 = vmax.f32 %v1811_v54, %v1812_v39  ;;  %v1821_v22 = vrot.slane %v1820_v47, 1  ;;  %v3425_v23 = vpop.f32.mrb[40].mxu0  ;;  %v3428_v24 = vmul.f32 %v3304_v15, %v1138_v53 }
 0x1fe   : > { %4214 = vst [vmem:[#allocation12_spill] sm:$0xff] %v3418_v12  ;;  %4215 = vst [vmem:[#allocation13_spill] sm:$0xff] %v3421_v42  ;;  %v3430_v27 = vpop.eup %2657  ;;  %v3432_v25 = vpop.f32.mrb[41].mxu0  ;;  %2673 = vrcp.f32 %v1369_v55  ;;  %v1377_v50 = vrot.slane %v1376_v7, 1 }
 0x1ff   : > { %4216 = vst [vmem:[#allocation14_spill] sm:$0xff] %v3428_v24  ;;  %v3436_v30 = vpop.eup %2659  ;;  %v1604_v8 = vadd.f32 %v3430_v27, %v3423_v49  ;;  %v1823_v60 = vsub.f32 %v3321_v31, %v1813_v1  ;;  %v1825_v13 = vsub.f32 %v3334_v41, %v1813_v1  ;;  %v1827_v15 = vsub.f32 %v3339_v56, %v1813_v1 }
 0x200   : > { %846 = vmax.xlane.f32.xlu1 %v845_v10  ;;  %v3443_v32 = vpop.eup %2661  ;;  %v1829_v35 = vsub.f32 %v3347_v18, %v1813_v1  ;;  %v1822_v6 = vmax.f32 %v1820_v47, %v1821_v22 }
 0x201   : > { %v3448_v51 = vpop.eup %2663  ;;  %v1605_v20 = vadd.f32 %v3436_v30, %v1604_v8  ;;  %v1831_v44 = vmul.f32 1.442695, %v1823_v60  ;;  %v1835_v31 = vmul.f32 1.442695, %v1825_v13  ;;  %v1839_v52 = vmul.f32 1.442695, %v1827_v15 }
 0x202   : > { %v3451_v41 = vpop.eup %2665  ;;  %v1843_v56 = vmul.f32 1.442695, %v1829_v35  ;;  %v1824_v53 = vsub.f32 %v3326_v33, %v1822_v6  ;;  %v1826_v54 = vsub.f32 %v3337_v46, %v1822_v6  ;;  %v1828_v18 = vsub.f32 %v3341_v2, %v1822_v6  ;;  %v3456_v57 = vpop.f32.mrb[42].mxu0 }
 0x203   : > { %v3458_v63 = vpop.eup %2667  ;;  %v1606_v5 = vadd.f32 %v3443_v32, %v1605_v20  ;;  %v1613_v39 = vadd.f32 %v3451_v41, %v3448_v51  ;;  %2675 = vpow2.f32 %v1831_v44  ;;  %v1830_v47 = vsub.f32 %v3353_v28, %v1822_v6  ;;  %v3464_v10 = vpop.f32.mrb[43].mxu0 }
 0x204   : > { %v3466_v55 = vpop.eup %2669  ;;  %2677 = vpow2.f32 %v1835_v31  ;;  %v1833_v33 = vmul.f32 1.442695, %v1824_v53  ;;  %v1837_v46 = vmul.f32 1.442695, %v1826_v54  ;;  %v1841_v8 = vmul.f32 1.442695, %v1828_v18 }
 0x205   : > { %v2672_v2 = vpop.eup %2671  ;;  %v1607_v1 = vrot.slane %v1606_v5, 4  ;;  %v1614_v22 = vadd.f32 %v3458_v63, %v1613_v39  ;;  %2679 = vpow2.f32 %v1839_v52  ;;  %v3469_v60 = vpop.f32.mrb[44].mxu0  ;;  %v1845_v13 = vmul.f32 1.442695, %v1830_v47 }
 0x206   : > { %2681 = vpow2.f32 %v1843_v56  ;;  %v3471_v15 = vpop.f32.mrb[45].mxu0  ;;  %v1139_v28 = vmul.f32 0.17677669, %v2672_v2  ;;  %v1378_v20 = vadd.f32 %v1377_v50, %v1376_v7 }
 0x207   : > { %v1608_v35 = vadd.f32 %v1607_v1, %v1606_v5  ;;  %v1615_v6 = vadd.f32 %v3466_v55, %v1614_v22  ;;  %2683 = vpow2.f32 %v1833_v33 }
 0x208   : > { %v2674_v44 = vpop.eup %2673  ;;  %2685 = vpow2.f32 %v1837_v46  ;;  %v3475_v31 = vmul.f32 %v3308_v19, %v1139_v28  ;;  %v3478_v52 = vmul.f32 %v3315_v26, %v1139_v28  ;;  %v3481_v53 = vmul.f32 %v3328_v34, %v1139_v28 }
 0x209   : > { %v1609_v56 = vrot.slane %v1608_v35, 2  ;;  %v1616_v54 = vrot.slane %v1615_v6, 4  ;;  %2687 = vpow2.f32 %v1841_v8  ;;  %v3483_v18 = vpop.f32.mrb[46].mxu0  ;;  %v3486_v5 = vmul.f32 %v3332_v37, %v1139_v28 }
 0x20a   : > { %4217 = vst [vmem:[#allocation15_spill] sm:$0xff] %v3475_v31  ;;  %4218 = vst [vmem:[#allocation16_spill] sm:$0xff] %v3478_v52  ;;  %2689 = vpow2.f32 %v1845_v13  ;;  %v3488_v7 = vpop.f32.mrb[47].mxu0  ;;  %v1381_v50 = vmul.f32 0.17677669, %v2674_v44 }
 0x20b   : > { %4219 = vst [vmem:[#allocation17_spill] sm:$0xff] %v3481_v53  ;;  %4220 = vst [vmem:[#allocation18_spill] sm:$0xff] %v3486_v5  ;;  %v1610_v26 = vadd.f32 %v1609_v56, %v1608_v35  ;;  %v1617_v39 = vadd.f32 %v1616_v54, %v1615_v6  ;;  %2691 = vrcp.f32 %v1378_v20 }
 0x20c   : > { %v3495_v47 = vmul.f32 %v3349_v21, %v1381_v50  ;;  %v3498_v33 = vmul.f32 %v3355_v29, %v1381_v50  ;;  %v3501_v37 = vmul.f32 %v3359_v4, %v1381_v50  ;;  %v3504_v46 = vmul.f32 %v3363_v62, %v1381_v50 }
 0x20d   : > { %v3506_v2 = vpop.eup %2675  ;;  %v1611_v1 = vrot.slane %v1610_v26, 1  ;;  %v1618_v22 = vrot.slane %v1617_v39, 2  ;;  %v3508_v8 = vpop.f32.mrb[48].mxu0 }
 0x20e   : > { %4221 = vst [vmem:[#allocation19_spill] sm:$0xff] %v3495_v47  ;;  %4222 = vst [vmem:[#allocation20_spill] sm:$0xff] %v3498_v33  ;;  %v3510_v13 = vpop.eup %2677  ;;  %v3512_v28 = vpop.f32.mrb[49].mxu0 }
 0x20f   : > { %4223 = vst [vmem:[#allocation21_spill] sm:$0xff] %v3501_v37  ;;  %4224 = vst [vmem:[#allocation22_spill] sm:$0xff] %v3504_v46  ;;  %v3518_v4 = vpop.eup %2679  ;;  %v1612_v62 = vadd.f32 %v1611_v1, %v1610_v26  ;;  %v1619_v35 = vadd.f32 %v1618_v22, %v1617_v39  ;;  %v1847_v6 = vadd.f32 %v3510_v13, %v3506_v2 }
 0x210   : > { %v3522_v20 = vpop.eup %2681 }
 0x211   : > { %v3524_v44 = vpop.eup %2683  ;;  %v1848_v56 = vadd.f32 %v3518_v4, %v1847_v6  ;;  %v3527_v54 = vpop.f32.mrb[50].mxu0  ;;  %v1620_v50 = vrot.slane %v1619_v35, 1  ;;  %2693 = vrcp.f32 %v1612_v62 }
 0x212   : > { %v3529_v21 = vpop.eup %2685  ;;  %v3531_v29 = vpop.f32.mrb[51].mxu0 }
 0x213   : > { %v3533_v43 = vpop.eup %2687  ;;  %v1849_v26 = vadd.f32 %v3522_v20, %v1848_v56  ;;  %v1856_v39 = vadd.f32 %v3529_v21, %v3524_v44  ;;  %v1621_v1 = vadd.f32 %v1620_v50, %v1619_v35 }
 0x214   : > { %v3538_v22 = vpop.eup %2689 }
 0x215   : > { %v2692_v34 = vpop.eup %2691  ;;  %v1850_v6 = vrot.slane %v1849_v26, 4  ;;  %v1857_v3 = vadd.f32 %v3533_v43, %v1856_v39  ;;  %v3541_v19 = vpop.f32.mrb[52].mxu0  ;;  %2695 = vrcp.f32 %v1621_v1 }
 0x216   : > { %v3543_v62 = vpop.f32.mrb[53].mxu0  ;;  %v1382_v0 = vmul.f32 0.17677669, %v2692_v34 }
 0x217   : > { %v1851_v37 = vadd.f32 %v1850_v6, %v1849_v26  ;;  %v1858_v46 = vadd.f32 %v3538_v22, %v1857_v3 }
 0x218   : > { %v3547_v56 = vmul.f32 %v3367_v38, %v1382_v0  ;;  %v3550_v35 = vmul.f32 %v3374_v48, %v1382_v0  ;;  %v3553_v50 = vmul.f32 %v3385_v61, %v1382_v0  ;;  %v3556_v39 = vmul.f32 %v3392_v17, %v1382_v0 }
 0x219   : > { %v1852_v47 = vrot.slane %v1851_v37, 2  ;;  %v1859_v1 = vrot.slane %v1858_v46, 4  ;;  %v3558_v33 = vpop.f32.mrb[54].mxu0 }
 0x21a   : > { %4225 = vst [vmem:[#allocation23_spill] sm:$0xff] %v3547_v56  ;;  %4226 = vst [vmem:[#allocation24_spill] sm:$0xff] %v3550_v35  ;;  %v3560_v34 = vpop.f32.mrb[55].mxu0 }
 0x21b   : > { %4227 = vst [vmem:[#allocation25_spill] sm:$0xff] %v3553_v50  ;;  %4228 = vst [vmem:[#allocation26_spill] sm:$0xff] %v3556_v39  ;;  %v2694_v48 = vpop.eup %2693  ;;  %v1853_v26 = vadd.f32 %v1852_v47, %v1851_v37  ;;  %v1860_v6 = vadd.f32 %v1859_v1, %v1858_v46  ;;  %v869_v61 = vmax.f32 %v3558_v33, %v3560_v34 }
 0x21c   : > { %v1624_v0 = vmul.f32 0.17677669, %v2694_v48 }
 0x21d   : > { %v1854_v17 = vrot.slane %v1853_v26, 1  ;;  %v1861_v42 = vrot.slane %v1860_v6, 2  ;;  %870 = vmax.xlane.f32.xlu0 %v869_v61 }
 0x21e   : > { %v3569_v24 = vmul.f32 %v3423_v49, %v1624_v0  ;;  %v3572_v53 = vmul.f32 %v3430_v27, %v1624_v0  ;;  %v3575_v3 = vmul.f32 %v3436_v30, %v1624_v0  ;;  %v3578_v38 = vmul.f32 %v3443_v32, %v1624_v0 }
 0x21f   : > { %v2696_v47 = vpop.eup %2695  ;;  %v1855_v37 = vadd.f32 %v1854_v17, %v1853_v26  ;;  %v1862_v46 = vadd.f32 %v1861_v42, %v1860_v6 }
 0x220   : > { %4229 = vst [vmem:[#allocation27_spill] sm:$0xff] %v3569_v24  ;;  %4230 = vst [vmem:[#allocation28_spill] sm:$0xff] %v3572_v53  ;;  %v1625_v1 = vmul.f32 0.17677669, %v2696_v47 }
 0x221   : > { %4231 = vst [vmem:[#allocation29_spill] sm:$0xff] %v3575_v3  ;;  %4232 = vst [vmem:[#allocation30_spill] sm:$0xff] %v3578_v38  ;;  %v1863_v61 = vrot.slane %v1862_v46, 1  ;;  %2697 = vrcp.f32 %v1855_v37 }
 0x222   : > { %v3585_v27 = vmul.f32 %v3448_v51, %v1625_v1  ;;  %v3588_v30 = vmul.f32 %v3451_v41, %v1625_v1  ;;  %v3591_v32 = vmul.f32 %v3458_v63, %v1625_v1  ;;  %v3594_v42 = vmul.f32 %v3466_v55, %v1625_v1  ;;  %v3640_v51 = vpop.f32.mrb[56].mxu0  ;;  %v3752_v63 = vpop.f32.mrb[0].mxu1 }
 0x223   : > { %v1864_v6 = vadd.f32 %v1863_v61, %v1862_v46 }
 0x224   : > { %4233 = vst [vmem:[#allocation31_spill] sm:$0xff] %v3585_v27  ;;  %4234 = vst [vmem:[#allocation32_spill] sm:$0xff] %v3588_v30 }
 0x225   : > { %4235 = vst [vmem:[#allocation33_spill] sm:$0xff] %v3591_v32  ;;  %4236 = vst [vmem:[#allocation34_spill] sm:$0xff] %v3594_v42  ;;  %2699 = vrcp.f32 %v1864_v6  ;;  %v3758_v42 = vpop.f32.mrb[1].mxu1 }
 0x22b   : > { %v2698_v17 = vpop.eup %2697 }
 0x22c   : > { %v1867_v55 = vmul.f32 0.17677669, %v2698_v17 }
 0x22e   : > { %v3607_v47 = vmul.f32 %v3506_v2, %v1867_v55  ;;  %v3610_v37 = vmul.f32 %v3510_v13, %v1867_v55  ;;  %v3613_v46 = vmul.f32 %v3518_v4, %v1867_v55  ;;  %v3616_v1 = vmul.f32 %v3522_v20, %v1867_v55  ;;  %v3642_v2 = vpop.f32.mrb[57].mxu0 }
 0x22f   : > { %v2700_v61 = vpop.eup %2699 }
 0x230   : > { %4237 = vst [vmem:[#allocation35_spill] sm:$0xff] %v3607_v47  ;;  %4238 = vst [vmem:[#allocation36_spill] sm:$0xff] %v3610_v37  ;;  %v1868_v49 = vmul.f32 0.17677669, %v2700_v61 }
 0x231   : > { %4239 = vst [vmem:[#allocation37_spill] sm:$0xff] %v3613_v46  ;;  %4240 = vst [vmem:[#allocation38_spill] sm:$0xff] %v3616_v1 }
 0x232   : > { %v3625_v13 = vmul.f32 %v3524_v44, %v1868_v49  ;;  %v3628_v4 = vmul.f32 %v3529_v21, %v1868_v49  ;;  %v3631_v20 = vmul.f32 %v3533_v43, %v1868_v49  ;;  %v3634_v55 = vmul.f32 %v3538_v22, %v1868_v49  ;;  %v3644_v44 = vpop.f32.mrb[58].mxu0 }
 0x233   : > { %v3646_v21 = vpop.f32.mrb[59].mxu0 }
 0x234   : > { %4241 = vst [vmem:[#allocation39_spill] sm:$0xff] %v3625_v13  ;;  %4242 = vst [vmem:[#allocation40_spill] sm:$0xff] %v3628_v4  ;;  %v3648_v48 = vpop.f32.mrb[60].mxu0 }
 0x235   : > { %4243 = vst [vmem:[#allocation41_spill] sm:$0xff] %v3631_v20  ;;  %4244 = vst [vmem:[#allocation42_spill] sm:$0xff] %v3634_v55  ;;  %v3650_v43 = vpop.f32.mrb[61].mxu0 }
 0x236   : > { %v3652_v22 = vpop.f32.mrb[62].mxu0 }
 0x237   : > { %v3654_v49 = vpop.f32.mrb[63].mxu0 }
 0x238   : > { %v741_v17 = vpop.f32.mrb[64].mxu0 }
 0x239   : > { %v743_v6 = vpop.f32.mrb[65].mxu0 }
 0x23a   : > { %v747_v37 = vpop.f32.mrb[66].mxu0 }
 0x23b   : > { %v2447_v3 = vpack.c.bf16 %v747_v37, %v741_v17  ;;  %v749_v38 = vpop.f32.mrb[67].mxu0 }
 0x284   : > { %v838_v0 = vpop.xlane.xlu1 %837 }
 0x285   : > { %v884_v41 = vsub.f32 %v3365_v36, %v838_v0  ;;  %v885_v26 = vsub.f32 %v3370_v45, %v838_v0  ;;  %v841_v46 = vpop.xlane.xlu0 %840  ;;  %v2445_v0 = vpack.c.bf16 %v749_v38, %v743_v6 }
 0x286   : > { %v886_v1 = vsub.f32 %v3390_v16, %v841_v46  ;;  %v887_v20 = vsub.f32 %v3395_v58, %v841_v46 }
 0x287   : > { %v916_v55 = vmul.f32 1.442695, %v884_v41  ;;  %v918_v47 = vmul.f32 1.442695, %v885_v26  ;;  %2446 = vmatprep.subr.bf16.mxu1 %v2445_v0  ;;  %v753_v26 = vpop.f32.mrb[68].mxu0 }
 0x288   : > { %v920_v13 = vmul.f32 1.442695, %v886_v1  ;;  %v922_v61 = vmul.f32 1.442695, %v887_v20  ;;  %v844_v4 = vpop.xlane.xlu1 %843  ;;  %2448 = vmatpush1.bf16.xpose.msra.mxu1 %v2447_v3  ;;  %v755_v37 = vpop.f32.mrb[69].mxu0 }
 0x289   : > { %2701 = vpow2.f32 %v916_v55  ;;  %v888_v36 = vsub.f32 %v3399_v11, %v844_v4  ;;  %v889_v45 = vsub.f32 %v3403_v40, %v844_v4  ;;  %v759_v40 = vpop.f32.mrb[70].mxu0 }
 0x28a   : > { %2703 = vpow2.f32 %v918_v47  ;;  %v2451_v38 = vpack.c.bf16 %v759_v40, %v753_v26  ;;  %v761_v47 = vpop.f32.mrb[71].mxu0 }
 0x28b   : > { %2705 = vpow2.f32 %v920_v13  ;;  %v924_v16 = vmul.f32 1.442695, %v888_v36  ;;  %v926_v58 = vmul.f32 1.442695, %v889_v45  ;;  %v2449_v13 = vpack.c.bf16 %v761_v47, %v755_v37 }
 0x28c   : > { %2707 = vpow2.f32 %v922_v61 }
 0x28d   : > { %v847_v41 = vpop.xlane.xlu1 %846  ;;  %2709 = vpow2.f32 %v924_v16  ;;  %2450 = vmatprep.subr.bf16.mxu1 %v2449_v13 }
 0x28e   : > { %v890_v46 = vsub.f32 %v3407_v59, %v847_v41  ;;  %v891_v1 = vsub.f32 %v3409_v9, %v847_v41  ;;  %2711 = vpow2.f32 %v926_v58 }
 0x290   : > { %v928_v11 = vmul.f32 1.442695, %v890_v46  ;;  %v930_v17 = vmul.f32 1.442695, %v891_v1  ;;  %2452 = vmatpush1.bf16.xpose.msra.mxu1 %v2451_v38  ;;  %v4245_v46 = vmax.f32 %v3425_v23, %v3432_v25  ;;  %v3705_v1 = vpop.f32.mrb[72].mxu0 }
 0x292   : > { %2713 = vpow2.f32 %v928_v11  ;;  %v4246_v11 = vmax.f32 %v3456_v57, %v3464_v10 }
 0x293   : > { %2715 = vpow2.f32 %v930_v17  ;;  %v3672_v4 = vpop.eup %2701  ;;  %v3710_v17 = vpop.f32.mrb[73].mxu0 }
 0x294   : > { %v3674_v3 = vpop.eup %2703  ;;  %v3712_v40 = vpop.f32.mrb[74].mxu0 }
 0x295   : > { %v3678_v9 = vpop.eup %2705  ;;  %v980_v20 = vadd.f32 %v3674_v3, %v3672_v4  ;;  %v3714_v38 = vpop.f32.mrb[75].mxu0 }
 0x296   : > { %v3682_v55 = vpop.eup %2707 }
 0x297   : > { %v3684_v61 = vpop.eup %2709  ;;  %981 = vadd.xlane.f32.xlu1 %v980_v20  ;;  %v983_v36 = vadd.f32 %v3682_v55, %v3678_v9  ;;  %v4247_v20 = vmax.f32 %v3469_v60, %v3471_v15 }
 0x298   : > { %v3688_v45 = vpop.eup %2711 }
 0x299   : > { %v986_v58 = vadd.f32 %v3688_v45, %v3684_v61 }
 0x29b   : > { %984 = vadd.xlane.f32.xlu1 %v983_v36  ;;  %v3723_v36 = vpop.f32.mrb[76].mxu0 }
 0x29c   : > { %v3692_v16 = vpop.eup %2713 }
 0x29d   : > { %v3696_v26 = vpop.eup %2715 }
 0x29e   : > { %v989_v37 = vadd.f32 %v3696_v26, %v3692_v16 }
 0x29f   : > { %987 = vadd.xlane.f32.xlu1 %v986_v58  ;;  %v3725_v58 = vpop.f32.mrb[77].mxu0  ;;  %v3762_v59 = vpop.f32.mrb[2].mxu1 }
 0x2a0   : > { %4249 = vst [vmem:[#allocation43_spill] sm:$0xff] %v3762_v59  ;;  %v3764_v53 = vpop.f32.mrb[3].mxu1 }
 0x2a3   : > { %990 = vadd.xlane.f32.xlu1 %v989_v37  ;;  %v3727_v37 = vpop.f32.mrb[78].mxu0  ;;  %v3766_v27 = vpop.f32.mrb[4].mxu1 }
 0x2a4   : > { %v3734_v47 = vpop.f32.mrb[79].mxu0  ;;  %v3770_v30 = vpop.f32.mrb[5].mxu1 }
 0x2a5   : > { %v3738_v41 = vpop.f32.mrb[80].mxu0 }
 0x2a7   : > { %849 = vmax.xlane.f32.xlu1 %v4245_v46  ;;  %v4248_v46 = vmax.f32 %v3483_v18, %v3488_v7  ;;  %v3774_v50 = vpop.f32.mrb[6].mxu1 }
 0x2a8   : > { %4250 = vst [vmem:[#allocation44_spill] sm:$0xff] %v3774_v50  ;;  %v3776_v39 = vpop.f32.mrb[7].mxu1 }
 0x2a9   : > { %4251 = vst [vmem:[#allocation45_spill] sm:$0xff] %v3776_v39 }
 0x2ab   : > { %852 = vmax.xlane.f32.xlu1 %v4246_v11  ;;  %v3778_v56 = vpop.f32.mrb[8].mxu1 }
 0x2ac   : > { %4252 = vst [vmem:[#allocation46_spill] sm:$0xff] %v3778_v56  ;;  %v3782_v35 = vpop.f32.mrb[9].mxu1 }
 0x2ad   : > { %4253 = vst [vmem:[#allocation47_spill] sm:$0xff] %v3782_v35 }
 0x2af   : > { %855 = vmax.xlane.f32.xlu1 %v4247_v20  ;;  %v3740_v20 = vpop.f32.mrb[81].mxu0 }
 0x2b0   : > { %v3742_v0 = vpop.f32.mrb[82].mxu0 }
 0x2b1   : > { %v3746_v6 = vpop.f32.mrb[83].mxu0 }
 0x2b2   : > { %v3750_v11 = vpop.f32.mrb[84].mxu0 }
 0x2b3   : > { %858 = vmax.xlane.f32.xlu1 %v4248_v46  ;;  %v3756_v32 = vpop.f32.mrb[85].mxu0 }
 0x324   : > { %v982_v46 = vpop.xlane.xlu1 %981 }
 0x325   : > { %2717 = vrcp.f32 %v982_v46 }
 0x328   : > { %v985_v14 = vpop.xlane.xlu1 %984 }
 0x329   : > { %2719 = vrcp.f32 %v985_v14 }
 0x32c   : > { %v988_v12 = vpop.xlane.xlu1 %987 }
 0x32d   : > { %2721 = vrcp.f32 %v988_v12 }
 0x32f   : > { %v2718_v13 = vpop.eup %2717 }
 0x330   : > { %v1044_v31 = vmul.f32 %v2718_v13, %v3672_v4  ;;  %v991_v52 = vpop.xlane.xlu1 %990  ;;  %v1045_v59 = vmul.f32 %v2718_v13, %v3674_v3 }
 0x331   : > { %2723 = vrcp.f32 %v991_v52 }
 0x332   : > { %1212 = vmatprep.mubr.f32.mxu1 %v1045_v59 }
 0x333   : > { %v2720_v24 = vpop.eup %2719  ;;  %1213 = vmatmul.mubr.f32.vlgmr.msra.gmra.mrb[10].mxu1 %v1044_v31 }
 0x334   : > { %v850_v50 = vpop.xlane.xlu1 %849  ;;  %v1047_v56 = vmul.f32 %v2720_v24, %v3682_v55  ;;  %v1046_v5 = vmul.f32 %v2720_v24, %v3678_v9 }
 0x335   : > { %v892_v46 = vsub.f32 %v3425_v23, %v850_v50  ;;  %v893_v14 = vsub.f32 %v3432_v25, %v850_v50 }
 0x336   : > { %1217 = vmatprep.mubr.f32.mxu1 %v1047_v56 }
 0x337   : > { %v2722_v12 = vpop.eup %2721  ;;  %v932_v39 = vmul.f32 1.442695, %v892_v46  ;;  %v934_v4 = vmul.f32 1.442695, %v893_v14  ;;  %1218 = vmatmul.mubr.f32.gmra.mrb[12].mxu1 %v1046_v5 }
 0x338   : > { %v853_v35 = vpop.xlane.xlu1 %852  ;;  %v1049_v52 = vmul.f32 %v2722_v12, %v3688_v45  ;;  %v1048_v3 = vmul.f32 %v2722_v12, %v3684_v61 }
 0x339   : > { %2725 = vpow2.f32 %v932_v39  ;;  %v894_v31 = vsub.f32 %v3456_v57, %v853_v35  ;;  %v895_v59 = vsub.f32 %v3464_v10, %v853_v35 }
 0x33a   : > { %2727 = vpow2.f32 %v934_v4  ;;  %1222 = vmatprep.mubr.f32.mxu1 %v1049_v52 }
 0x33b   : > { %v2724_v23 = vpop.eup %2723  ;;  %v936_v24 = vmul.f32 1.442695, %v894_v31  ;;  %v938_v25 = vmul.f32 1.442695, %v895_v59  ;;  %1223 = vmatmul.mubr.f32.gmra.mrb[14].mxu1 %v1048_v3  ;;  %v4254_v31 = vmax.f32 %v3508_v8, %v3512_v28  ;;  %v4255_v59 = vmax.f32 %v3527_v54, %v3531_v29 }
 0x33c   : > { %v856_v56 = vpop.xlane.xlu1 %855  ;;  %v1051_v50 = vmul.f32 %v2724_v23, %v3696_v26  ;;  %v1050_v5 = vmul.f32 %v2724_v23, %v3692_v16  ;;  %v4256_v23 = vmax.f32 %v3541_v19, %v3543_v62 }
 0x33d   : > { %2729 = vpow2.f32 %v936_v24  ;;  %v896_v9 = vsub.f32 %v3469_v60, %v856_v56  ;;  %v897_v39 = vsub.f32 %v3471_v15, %v856_v56  ;;  %v2932_v24 = vmov 0.0|0.0  }
 0x33e   : > { %2731 = vpow2.f32 %v938_v25  ;;  %1227 = vmatprep.mubr.f32.mxu1 %v1051_v50  ;;  %2453 = vmatprep.subr.bf16.mxu1 %v2932_v24  ;;  %v4257_v25 = vmov 0.0  }
 0x33f   : > { %v940_v57 = vmul.f32 1.442695, %v896_v9  ;;  %v942_v10 = vmul.f32 1.442695, %v897_v39  ;;  %1228 = vmatmul.mubr.f32.gmra.mrb[16].mxu1 %v1050_v5  ;;  %v871_v39 = vpop.xlane.xlu0 %870 }
 0x340   : > { %v859_v35 = vpop.xlane.xlu1 %858  ;;  %2409 = vmatprep.mubr.msk.f32.mxu1 %vm2933_vm2, %v4257_v25 }
 0x341   : > { %2733 = vpow2.f32 %v940_v57  ;;  %v898_v55 = vsub.f32 %v3483_v18, %v859_v35  ;;  %v899_v61 = vsub.f32 %v3488_v7, %v859_v35 }
 0x342   : > { %2735 = vpow2.f32 %v942_v10 }
 0x343   : > { %v3802_v45 = vpop.eup %2725  ;;  %v944_v16 = vmul.f32 1.442695, %v898_v55  ;;  %v946_v26 = vmul.f32 1.442695, %v899_v61  ;;  %v906_v55 = vsub.f32 %v3558_v33, %v871_v39 }
 0x344   : > { %v3804_v13 = vpop.eup %2727 }
 0x345   : > { %2737 = vpow2.f32 %v944_v16  ;;  %v992_v60 = vadd.f32 %v3804_v13, %v3802_v45 }
 0x346   : > { %2739 = vpow2.f32 %v946_v26  ;;  %v907_v26 = vsub.f32 %v3560_v34, %v871_v39 }
 0x347   : > { %v3808_v15 = vpop.eup %2729  ;;  %993 = vadd.xlane.f32.xlu1 %v992_v60 }
 0x348   : > { %v3810_v46 = vpop.eup %2731 }
 0x349   : > { %v995_v18 = vadd.f32 %v3810_v46, %v3808_v15 }
 0x34b   : > { %v3814_v7 = vpop.eup %2733  ;;  %996 = vadd.xlane.f32.xlu1 %v995_v18 }
 0x34c   : > { %v3816_v14 = vpop.eup %2735 }
 0x34d   : > { %v998_v12 = vadd.f32 %v3816_v14, %v3814_v7 }
 0x34f   : > { %v3820_v4 = vpop.eup %2737  ;;  %999 = vadd.xlane.f32.xlu1 %v998_v12 }
 0x350   : > { %v3822_v52 = vpop.eup %2739 }
 0x351   : > { %v1001_v3 = vadd.f32 %v3822_v52, %v3820_v4 }
 0x353   : > { %1002 = vadd.xlane.f32.xlu1 %v1001_v3  ;;  %v960_v3 = vmul.f32 1.442695, %v906_v55 }
 0x357   : > { %861 = vmax.xlane.f32.xlu1 %v4254_v31 }
 0x35b   : > { %864 = vmax.xlane.f32.xlu1 %v4255_v59 }
 0x35f   : > { %867 = vmax.xlane.f32.xlu1 %v4256_v23  ;;  %v962_v23 = vmul.f32 1.442695, %v907_v26 }
 0x3d4   : > { %v994_v56 = vpop.xlane.xlu1 %993 }
 0x3d8   : > { %v3838_v50 = vpop.xlane.xlu1 %996 }
 0x3dc   : > { %v3840_v5 = vpop.xlane.xlu1 %999 }
 0x3e0   : > { %v3842_v9 = vpop.xlane.xlu1 %1002 }
 0x3e4   : > { %v862_v57 = vpop.xlane.xlu1 %861 }
 0x3e5   : > { %v900_v10 = vsub.f32 %v3508_v8, %v862_v57  ;;  %v901_v35 = vsub.f32 %v3512_v28, %v862_v57 }
 0x3e7   : > { %v948_v61 = vmul.f32 1.442695, %v900_v10  ;;  %v950_v16 = vmul.f32 1.442695, %v901_v35 }
 0x3e8   : > { %v865_v60 = vpop.xlane.xlu1 %864 }
 0x3e9   : > { %2741 = vpow2.f32 %v948_v61  ;;  %v902_v18 = vsub.f32 %v3527_v54, %v865_v60  ;;  %v903_v12 = vsub.f32 %v3531_v29, %v865_v60 }
 0x3ea   : > { %2743 = vpow2.f32 %v950_v16 }
 0x3eb   : > { %v952_v31 = vmul.f32 1.442695, %v902_v18  ;;  %v954_v59 = vmul.f32 1.442695, %v903_v12  ;;  %v4258_v18 = vmax.f32 %v3640_v51, %v3642_v2 }
 0x3ec   : > { %v868_v8 = vpop.xlane.xlu1 %867 }
 0x3ed   : > { %2745 = vpow2.f32 %v952_v31  ;;  %v904_v28 = vsub.f32 %v3541_v19, %v868_v8  ;;  %v905_v33 = vsub.f32 %v3543_v62, %v868_v8  ;;  %v4262_v8 = vmax.f32 %v3648_v48, %v3650_v43 }
 0x3ee   : > { %2747 = vpow2.f32 %v954_v59 }
 0x3ef   : > { %2749 = vpow2.f32 %v960_v3  ;;  %v956_v34 = vmul.f32 1.442695, %v904_v28  ;;  %v958_v39 = vmul.f32 1.442695, %v905_v33  ;;  %v4259_v3 = vmax.f32 %v3644_v44, %v3646_v21 }
 0x3f0   : > { %2751 = vpow2.f32 %v962_v23  ;;  %v4291_v23 = vld [vmem:[#allocation13_spill] sm:$0xff] }
 0x3f1   : > { %2753 = vpow2.f32 %v956_v34 }
 0x3f2   : > { %2755 = vpow2.f32 %v958_v39  ;;  %v4263_v39 = vmax.f32 %v3652_v22, %v3654_v49 }
 0x3f3   : > { %v3852_v54 = vpop.eup %2741  ;;  %2757 = vrcp.f32 %v994_v56 }
 0x3f4   : > { %v3854_v29 = vpop.eup %2743  ;;  %2759 = vrcp.f32 %v3838_v50 }
 0x3f5   : > { %v1004_v57 = vadd.f32 %v3854_v29, %v3852_v54  ;;  %2761 = vrcp.f32 %v3840_v5 }
 0x3f6   : > { %2763 = vrcp.f32 %v3842_v9 }
 0x3f7   : > { %v3858_v10 = vpop.eup %2745  ;;  %1005 = vadd.xlane.f32.xlu1 %v1004_v57 }
 0x3f8   : > { %v3860_v19 = vpop.eup %2747 }
 0x3f9   : > { %v3862_v62 = vpop.eup %2749  ;;  %v1007_v35 = vadd.f32 %v3860_v19, %v3858_v10 }
 0x3fa   : > { %v3866_v55 = vpop.eup %2751 }
 0x3fb   : > { %v3868_v61 = vpop.eup %2753  ;;  %1008 = vadd.xlane.f32.xlu0 %v1007_v35  ;;  %v1013_v60 = vadd.f32 %v3866_v55, %v3862_v62  ;;  %v3900_v35 = vld [vmem:[%s4153_s2] sm:$0xf] }
 0x3fc   : > { %v3870_v16 = vpop.eup %2755 }
 0x3fd   : > { %v1010_v26 = vadd.f32 %v3870_v16, %v3868_v61 }
 0x3ff   : > { %1011 = vadd.xlane.f32.xlu1 %v1010_v26  ;;  %1014 = vadd.xlane.f32.xlu0 %v1013_v60 }
 0x403   : > { %873 = vmax.xlane.f32.xlu0 %v4258_v18  ;;  %v4264_v18 = vpack.c.bf16 %v3714_v38, %v3710_v17  ;;  %v4267_v17 = vpack.c.bf16 %v3727_v37, %v3723_v36 }
 0x406   : > { %v1214_v12 = vpop.f32.mrb[10].mxu1 }
 0x407   : > { %876 = vmax.xlane.f32.xlu0 %v4259_v3  ;;  %v1216_v31 = vpop.f32.mrb[11].mxu1 }
 0x408   : > { %v4265_v31 = vpack.c.bf16 %v3712_v40, %v3705_v1 }
 0x40a   : > { %v1219_v59 = vpop.f32.mrb[12].mxu1 }
 0x40b   : > { %879 = vmax.xlane.f32.xlu0 %v4262_v8  ;;  %v2454_v28 = vpack.c.bf16 %v1219_v59, %v1214_v12  ;;  %v1221_v33 = vpop.f32.mrb[13].mxu1  ;;  %v2758_v12 = vpop.eup %2757  ;;  %v4266_v59 = vpack.c.bf16 %v3734_v47, %v3725_v58 }
 0x40c   : > { %v1053_v3 = vmul.f32 %v2758_v12, %v3804_v13  ;;  %v2760_v38 = vpop.eup %2759  ;;  %v1052_v1 = vmul.f32 %v2758_v12, %v3802_v45 }
 0x40d   : > { %2456 = vmatpush3.bf16.xpose.msk.msra.mxu1 %vm3884_vm4, %v2454_v28  ;;  %v1055_v40 = vmul.f32 %v2760_v38, %v3810_v46  ;;  %v2762_v13 = vpop.eup %2761  ;;  %v1054_v47 = vmul.f32 %v2760_v38, %v3808_v15 }
 0x40e   : > { %v1224_v34 = vpop.f32.mrb[14].mxu1  ;;  %2457 = vmatprep.subr.bf16.mxu1 %v2932_v24  ;;  %v1057_v58 = vmul.f32 %v2762_v13, %v3816_v14  ;;  %v2764_v50 = vpop.eup %2763  ;;  %v1056_v36 = vmul.f32 %v2762_v13, %v3814_v7 }
 0x40f   : > { %882 = vmax.xlane.f32.xlu0 %v4263_v39  ;;  %v1226_v57 = vpop.f32.mrb[15].mxu1  ;;  %v1059_v37 = vmul.f32 %v2764_v50, %v3822_v52  ;;  %v1058_v45 = vmul.f32 %v2764_v50, %v3820_v4 }
 0x410   : > { %1476 = vrot.lane.b32.xlu1 %v3900_v35, %s2934_s25 }
 0x412   : > { %v1229_v26 = vpop.f32.mrb[16].mxu1 }
 0x413   : > { %v2458_v60 = vpack.c.bf16 %v1229_v26, %v1224_v34  ;;  %v1231_v56 = vpop.f32.mrb[17].mxu1 }
 0x415   : > { %2460 = vmatpush3.bf16.xpose.msk.msra.mxu1 %vm3884_vm4, %v2458_v60 }
 0x416   : > { %2462 = vmatprep.subr.bf16.mxu1 %v4264_v18 }
 0x41c   : > { %2410 = vmatmul.mubr.msk.f32.vlgmr.msra.gmra.mrb[18].mxu1 %vm1233_vm3, %v3900_v35 }
 0x41d   : > { %2464 = vmatpush1.bf16.xpose.msra.mxu1 %v4265_v31  ;;  %1455 = vmatprep.mubr.f32.mxu1 %v1053_v3 }
 0x41e   : > { %2466 = vmatprep.subr.bf16.mxu1 %v4266_v59 }
 0x425   : > { %2468 = vmatpush1.bf16.xpose.msra.mxu1 %v4267_v17 }
 0x426   : > { %2469 = vmatprep.subr.bf16.mxu1 %v2932_v24 }
 0x42c   : > { %1456 = vmatmul.mubr.f32.vlgmr.msra.gmra.mrb[20].mxu1 %v1052_v1 }
 0x42d   : > { %1460 = vmatprep.mubr.f32.mxu1 %v1055_v40 }
 0x430   : > { %1461 = vmatmul.mubr.f32.gmra.mrb[22].mxu1 %v1054_v47 }
 0x431   : > { %1465 = vmatprep.mubr.f32.mxu1 %v1057_v58 }
 0x434   : > { %1466 = vmatmul.mubr.f32.gmra.mrb[24].mxu1 %v1056_v36 }
 0x435   : > { %1470 = vmatprep.mubr.f32.mxu1 %v1059_v37 }
 0x438   : > { %1471 = vmatmul.mubr.f32.gmra.mrb[26].mxu1 %v1058_v45 }
 0x439   : > { %2420 = vmatprep.mubr.msk.f32.mxu1 %vm2933_vm2, %v4257_v25 }
 0x484   : > { %v1006_v37 = vpop.xlane.xlu1 %1005 }
 0x488   : > { %v3934_v46 = vpop.xlane.xlu0 %1008 }
 0x48c   : > { %v3936_v15 = vpop.xlane.xlu0 %1014 }
 0x490   : > { %v874_v14 = vpop.xlane.xlu0 %873 }
 0x491   : > { %v908_v5 = vsub.f32 %v3640_v51, %v874_v14  ;;  %v909_v9 = vsub.f32 %v3642_v2, %v874_v14 }
 0x493   : > { %v964_v7 = vmul.f32 1.442695, %v908_v5  ;;  %v966_v8 = vmul.f32 1.442695, %v909_v9 }
 0x494   : > { %v877_v52 = vpop.xlane.xlu0 %876 }
 0x495   : > { %2765 = vpow2.f32 %v964_v7  ;;  %v910_v28 = vsub.f32 %v3644_v44, %v877_v52  ;;  %v911_v4 = vsub.f32 %v3646_v21, %v877_v52 }
 0x496   : > { %2767 = vpow2.f32 %v966_v8 }
 0x497   : > { %v968_v33 = vmul.f32 1.442695, %v910_v28  ;;  %v970_v34 = vmul.f32 1.442695, %v911_v4  ;;  %v1012_v28 = vpop.xlane.xlu1 %1011  ;;  %v4268_v4 = vpack.c.bf16 %v3746_v6, %v3740_v20  ;;  %v4271_v6 = vpack.c.bf16 %v3752_v63, %v3750_v11 }
 0x498   : > { %v880_v39 = vpop.xlane.xlu0 %879 }
 0x499   : > { %2769 = vpow2.f32 %v968_v33  ;;  %v912_v57 = vsub.f32 %v3648_v48, %v880_v39  ;;  %v913_v26 = vsub.f32 %v3650_v43, %v880_v39 }
 0x49a   : > { %2771 = vpow2.f32 %v970_v34 }
 0x49b   : > { %v972_v51 = vmul.f32 1.442695, %v912_v57  ;;  %v974_v2 = vmul.f32 1.442695, %v913_v26  ;;  %v1477_v34 = vpop.permute.xlu1 %1476  ;;  %v4269_v57 = vpack.c.bf16 %v3742_v0, %v3738_v41  ;;  %v4270_v26 = vpack.c.bf16 %v3758_v42, %v3756_v32 }
 0x49c   : > { %v883_v60 = vpop.xlane.xlu0 %882 }
 0x49d   : > { %2773 = vpow2.f32 %v972_v51  ;;  %v914_v56 = vsub.f32 %v3652_v22, %v883_v60  ;;  %v915_v44 = vsub.f32 %v3654_v49, %v883_v60 }
 0x49e   : > { %2775 = vpow2.f32 %v974_v2 }
 0x49f   : > { %v3946_v21 = vpop.eup %2765  ;;  %v976_v18 = vmul.f32 1.442695, %v914_v56  ;;  %v978_v12 = vmul.f32 1.442695, %v915_v44 }
 0x4a0   : > { %v3948_v3 = vpop.eup %2767 }
 0x4a1   : > { %2777 = vpow2.f32 %v976_v18  ;;  %v1016_v48 = vadd.f32 %v3948_v3, %v3946_v21 }
 0x4a2   : > { %2779 = vpow2.f32 %v978_v12 }
 0x4a3   : > { %v3952_v43 = vpop.eup %2769  ;;  %1017 = vadd.xlane.f32.xlu1 %v1016_v48  ;;  %2781 = vrcp.f32 %v1006_v37  ;;  %v4276_v37 = vld [vmem:[#allocation45_spill] sm:$0xff] }
 0x4a4   : > { %v3954_v31 = vpop.eup %2771  ;;  %2783 = vrcp.f32 %v3934_v46 }
 0x4a5   : > { %v1019_v22 = vadd.f32 %v3954_v31, %v3952_v43  ;;  %2785 = vrcp.f32 %v1012_v28 }
 0x4a6   : > { %2787 = vrcp.f32 %v3936_v15 }
 0x4a7   : > { %v3958_v49 = vpop.eup %2773  ;;  %1020 = vadd.xlane.f32.xlu0 %v1019_v22  ;;  %v4272_v22 = vpack.c.bf16 %v3770_v30, %v3764_v53  ;;  %v4279_v53 = vld [vmem:[#allocation44_spill] sm:$0xff] }
 0x4a8   : > { %v3960_v59 = vpop.eup %2775 }
 0x4a9   : > { %v1022_v17 = vadd.f32 %v3960_v59, %v3958_v49 }
 0x4ab   : > { %v3964_v38 = vpop.eup %2777  ;;  %1023 = vadd.xlane.f32.xlu0 %v1022_v17 }
 0x4ac   : > { %v3966_v1 = vpop.eup %2779 }
 0x4ad   : > { %v1025_v40 = vadd.f32 %v3966_v1, %v3964_v38  ;;  %v2782_v33 = vpop.eup %2781 }
 0x4ae   : > { %v1061_v39 = vmul.f32 %v2782_v33, %v3854_v29  ;;  %v2784_v20 = vpop.eup %2783  ;;  %v1060_v0 = vmul.f32 %v2782_v33, %v3852_v54 }
 0x4af   : > { %1026 = vadd.xlane.f32.xlu0 %v1025_v40  ;;  %v1063_v41 = vmul.f32 %v2784_v20, %v3860_v19  ;;  %v2786_v29 = vpop.eup %2785  ;;  %v1062_v32 = vmul.f32 %v2784_v20, %v3858_v10  ;;  %v4281_v20 = vld [vmem:[#allocation16_spill] sm:$0xff] }
 0x4b0   : > { %v1065_v42 = vmul.f32 %v2786_v29, %v3870_v16  ;;  %v2788_v46 = vpop.eup %2787  ;;  %v1064_v63 = vmul.f32 %v2786_v29, %v3868_v61 }
 0x4b1   : > { %v1067_v11 = vmul.f32 %v2788_v46, %v3866_v55  ;;  %v1066_v54 = vmul.f32 %v2788_v46, %v3862_v62 }
 0x4c5   : > { %1719 = vrot.lane.b32.xlu0 %v3900_v35, %s2935_s30 }
 0x4c9   : > { %1962 = vrot.lane.b32.xlu0 %v3900_v35, %s2936_s8 }
 0x4ef   : > { %v3972_v13 = vpop.f32.mrb[18].mxu1 }
 0x4f0   : > { %v2411_v47 = vpop.f32.mrb[19].mxu1 }
 0x4ff   : > { %v1457_v58 = vpop.f32.mrb[20].mxu1 }
 0x500   : > { %v1459_v50 = vpop.f32.mrb[21].mxu1 }
 0x503   : > { %v1462_v36 = vpop.f32.mrb[22].mxu1 }
 0x504   : > { %v2470_v45 = vpack.c.bf16 %v1462_v36, %v1457_v58  ;;  %v1464_v14 = vpop.f32.mrb[23].mxu1  ;;  %v4273_v58 = vld [vmem:[#allocation43_spill] sm:$0xff] }
 0x505   : > { %v4274_v50 = vpack.c.bf16 %v3766_v27, %v4273_v58  ;;  %v4275_v36 = vld [vmem:[#allocation47_spill] sm:$0xff]  ;;  %v4278_v14 = vld [vmem:[#allocation46_spill] sm:$0xff] }
 0x506   : > { %2472 = vmatpush3.bf16.xpose.msk.msra.mxu1 %vm3884_vm4, %v2470_v45  ;;  %v4277_v45 = vpack.c.bf16 %v4275_v36, %v4276_v37  ;;  %v4280_v30 = vpack.c.bf16 %v4278_v14, %v4279_v53  ;;  %v4315_v36 = vld [vmem:[#allocation29_spill] sm:$0xff]  ;;  %v4318_v14 = vld [vmem:[#allocation39_spill] sm:$0xff] }
 0x507   : > { %v1467_v5 = vpop.f32.mrb[24].mxu1  ;;  %2473 = vmatprep.subr.bf16.mxu1 %v2932_v24 }
 0x508   : > { %v1469_v9 = vpop.f32.mrb[25].mxu1 }
 0x50b   : > { %v1472_v7 = vpop.f32.mrb[26].mxu1 }
 0x50c   : > { %v2474_v8 = vpack.c.bf16 %v1472_v7, %v1467_v5  ;;  %v1474_v52 = vpop.f32.mrb[27].mxu1 }
 0x50e   : > { %2476 = vmatpush3.bf16.xpose.msk.msra.mxu1 %vm3884_vm4, %v2474_v8 }
 0x50f   : > { %2478 = vmatprep.subr.bf16.mxu1 %v4268_v4 }
 0x515   : > { %2421 = vmatmul.mubr.msk.f32.vlgmr.msra.gmra.mrb[28].mxu1 %vm1233_vm3, %v1477_v34 }
 0x516   : > { %2480 = vmatpush1.bf16.xpose.msra.mxu1 %v4269_v57  ;;  %1698 = vmatprep.mubr.f32.mxu1 %v1061_v39 }
 0x517   : > { %2482 = vmatprep.subr.bf16.mxu1 %v4270_v26 }
 0x51e   : > { %2484 = vmatpush1.bf16.xpose.msra.mxu1 %v4271_v6 }
 0x51f   : > { %2485 = vmatprep.subr.bf16.mxu1 %v2932_v24 }
 0x525   : > { %1699 = vmatmul.mubr.f32.vlgmr.msra.gmra.mrb[30].mxu1 %v1060_v0  ;;  %v4282_v0 = vld [vmem:[#allocation15_spill] sm:$0xff] }
 0x526   : > { %1703 = vmatprep.mubr.f32.mxu1 %v1063_v41  ;;  %v4283_v41 = vpack.c.bf16 %v4281_v20, %v4282_v0 }
 0x529   : > { %1704 = vmatmul.mubr.f32.gmra.mrb[32].mxu1 %v1062_v32  ;;  %v4284_v32 = vld [vmem:[#allocation12_spill] sm:$0xff] }
 0x52a   : > { %1708 = vmatprep.mubr.f32.mxu1 %v1065_v42  ;;  %v4285_v42 = vld [vmem:[#allocation11_spill] sm:$0xff] }
 0x52b   : > { %v4286_v46 = vpack.c.bf16 %v4284_v32, %v4285_v42 }
 0x52d   : > { %1709 = vmatmul.mubr.f32.gmra.mrb[34].mxu1 %v1064_v63  ;;  %v4288_v63 = vld [vmem:[#allocation17_spill] sm:$0xff] }
 0x52e   : > { %1713 = vmatprep.mubr.f32.mxu1 %v1067_v11 }
 0x530   : > { %v1018_v2 = vpop.xlane.xlu1 %1017 }
 0x531   : > { %1714 = vmatmul.mubr.f32.gmra.mrb[36].mxu1 %v1066_v54  ;;  %2789 = vrcp.f32 %v1018_v2  ;;  %v4290_v54 = vld [vmem:[#allocation14_spill] sm:$0xff] }
 0x532   : > { %2431 = vmatprep.mubr.msk.f32.mxu1 %vm2933_vm2, %v4257_v25 }
 0x534   : > { %v1021_v51 = vpop.xlane.xlu0 %1020 }
 0x535   : > { %2791 = vrcp.f32 %v1021_v51  ;;  %v4296_v51 = vld [vmem:[#allocation20_spill] sm:$0xff] }
 0x538   : > { %v1024_v56 = vpop.xlane.xlu0 %1023 }
 0x539   : > { %2793 = vrcp.f32 %v1024_v56  ;;  %v4303_v56 = vld [vmem:[#allocation21_spill] sm:$0xff] }
 0x53b   : > { %v2790_v17 = vpop.eup %2789 }
 0x53c   : > { %v1027_v48 = vpop.xlane.xlu0 %1026  ;;  %v1069_v47 = vmul.f32 %v2790_v17, %v3948_v3  ;;  %v1068_v5 = vmul.f32 %v2790_v17, %v3946_v21 }
 0x53d   : > { %2795 = vrcp.f32 %v1027_v48  ;;  %v4308_v48 = vld [vmem:[#allocation28_spill] sm:$0xff] }
 0x53f   : > { %v2792_v3 = vpop.eup %2791 }
 0x540   : > { %v1720_v40 = vpop.permute.xlu0 %1719  ;;  %v1071_v27 = vmul.f32 %v2792_v3, %v3954_v31  ;;  %v1070_v7 = vmul.f32 %v2792_v3, %v3952_v43  ;;  %v4321_v3 = vld [vmem:[#allocation35_spill] sm:$0xff] }
 0x543   : > { %v2794_v9 = vpop.eup %2793 }
 0x544   : > { %v1073_v8 = vmul.f32 %v2794_v9, %v3960_v59  ;;  %v1072_v28 = vmul.f32 %v2794_v9, %v3958_v49  ;;  %v1963_v29 = vpop.permute.xlu0 %1962  ;;  %v4324_v9 = vld [vmem:[#allocation41_spill] sm:$0xff] }
 0x547   : > { %v2796_v52 = vpop.eup %2795 }
 0x548   : > { %v1075_v4 = vmul.f32 %v2796_v52, %v3966_v1  ;;  %v1074_v21 = vmul.f32 %v2796_v52, %v3964_v38  ;;  %v4327_v52 = vld [vmem:[#allocation37_spill] sm:$0xff] }
 0x5e8   : > { %v1558_v10 = vpop.f32.mrb[28].mxu1 }
 0x5e9   : > { %v2422_v19 = vpop.f32.mrb[29].mxu1  ;;  %2049 = vrot.lane.b32.xlu1 %v1558_v10, %s2936_s8  ;;  %v4292_v10 = vpack.c.bf16 %v4290_v54, %v4291_v23 }
 0x5ea   : > { %v4293_v19 = vld [vmem:[#allocation24_spill] sm:$0xff] }
 0x5f8   : > { %v1700_v16 = vpop.f32.mrb[30].mxu1 }
 0x5f9   : > { %v1702_v15 = vpop.f32.mrb[31].mxu1 }
 0x5fc   : > { %v1705_v61 = vpop.f32.mrb[32].mxu1 }
 0x5fd   : > { %v2486_v55 = vpack.c.bf16 %v1705_v61, %v1700_v16  ;;  %v1707_v60 = vpop.f32.mrb[33].mxu1  ;;  %v4294_v16 = vld [vmem:[#allocation23_spill] sm:$0xff] }
 0x5fe   : > { %v4295_v15 = vpack.c.bf16 %v4293_v19, %v4294_v16  ;;  %v4297_v61 = vld [vmem:[#allocation19_spill] sm:$0xff]  ;;  %v4300_v60 = vld [vmem:[#allocation25_spill] sm:$0xff] }
 0x5ff   : > { %2488 = vmatpush3.bf16.xpose.msk.msra.mxu1 %vm3884_vm4, %v2486_v55  ;;  %v4298_v2 = vpack.c.bf16 %v4296_v51, %v4297_v61  ;;  %v4299_v55 = vld [vmem:[#allocation26_spill] sm:$0xff] }
 0x600   : > { %v1710_v62 = vpop.f32.mrb[34].mxu1  ;;  %2489 = vmatprep.subr.bf16.mxu1 %v2932_v24 }
 0x601   : > { %v1712_v44 = vpop.f32.mrb[35].mxu1 }
 0x604   : > { %v1715_v35 = vpop.f32.mrb[36].mxu1 }
 0x605   : > { %v2490_v18 = vpack.c.bf16 %v1715_v35, %v1710_v62  ;;  %v1717_v12 = vpop.f32.mrb[37].mxu1  ;;  %v4301_v62 = vpack.c.bf16 %v4299_v55, %v4300_v60  ;;  %v4305_v35 = vld [vmem:[#allocation32_spill] sm:$0xff] }
 0x607   : > { %2492 = vmatpush3.bf16.xpose.msk.msra.mxu1 %vm3884_vm4, %v2490_v18  ;;  %v4306_v18 = vld [vmem:[#allocation31_spill] sm:$0xff] }
 0x608   : > { %2494 = vmatprep.subr.bf16.mxu1 %v4272_v22  ;;  %v4307_v12 = vpack.c.bf16 %v4305_v35, %v4306_v18  ;;  %v4309_v22 = vld [vmem:[#allocation27_spill] sm:$0xff] }
 0x609   : > { %v4310_v17 = vpack.c.bf16 %v4308_v48, %v4309_v22 }
 0x60e   : > { %2432 = vmatmul.mubr.msk.f32.vlgmr.msra.gmra.mrb[38].mxu1 %vm1233_vm3, %v1720_v40  ;;  %v4311_v40 = vld [vmem:[#allocation34_spill] sm:$0xff] }
 0x60f   : > { %2496 = vmatpush1.bf16.xpose.msra.mxu1 %v4274_v50  ;;  %1941 = vmatprep.mubr.f32.mxu1 %v1069_v47  ;;  %v4312_v47 = vld [vmem:[#allocation33_spill] sm:$0xff]  ;;  %v4314_v50 = vld [vmem:[#allocation30_spill] sm:$0xff] }
 0x610   : > { %2498 = vmatprep.subr.bf16.mxu1 %v4277_v45  ;;  %v4313_v58 = vpack.c.bf16 %v4311_v40, %v4312_v47  ;;  %v4316_v37 = vpack.c.bf16 %v4314_v50, %v4315_v36  ;;  %v4317_v45 = vld [vmem:[#allocation40_spill] sm:$0xff] }
 0x611   : > { %v4319_v53 = vpack.c.bf16 %v4317_v45, %v4318_v14 }
 0x617   : > { %2500 = vmatpush1.bf16.xpose.msra.mxu1 %v4280_v30  ;;  %v4320_v30 = vld [vmem:[#allocation36_spill] sm:$0xff] }
 0x618   : > { %2501 = vmatprep.subr.bf16.mxu1 %v2932_v24 }
 0x61e   : > { %1942 = vmatmul.mubr.f32.vlgmr.msra.gmra.mrb[40].mxu1 %v1068_v5  ;;  %v4322_v5 = vpack.c.bf16 %v4320_v30, %v4321_v3 }
 0x61f   : > { %1946 = vmatprep.mubr.f32.mxu1 %v1071_v27  ;;  %v4323_v27 = vld [vmem:[#allocation42_spill] sm:$0xff] }
 0x622   : > { %1947 = vmatmul.mubr.f32.gmra.mrb[42].mxu1 %v1070_v7  ;;  %v4325_v7 = vpack.c.bf16 %v4323_v27, %v4324_v9 }
 0x623   : > { %1951 = vmatprep.mubr.f32.mxu1 %v1073_v8  ;;  %v4326_v8 = vld [vmem:[#allocation38_spill] sm:$0xff] }
 0x626   : > { %1952 = vmatmul.mubr.f32.gmra.mrb[44].mxu1 %v1072_v28  ;;  %v4328_v28 = vpack.c.bf16 %v4326_v8, %v4327_v52 }
 0x627   : > { %1956 = vmatprep.mubr.f32.mxu1 %v1075_v4  ;;  %v2937_v4 = vmov 0  }
 0x628   : > { %2615 = vset.pattern.permute.xlu0 %v2937_v4 }
 0x62a   : > { %1957 = vmatmul.mubr.f32.gmra.mrb[46].mxu1 %v1074_v21 }
 0x62b   : > { %2442 = vmatprep.mubr.msk.f32.mxu1 %vm2933_vm2, %v4257_v25 }
 0x6e1   : > { %v1801_v31 = vpop.f32.mrb[38].mxu1 }
 0x6e2   : > { %2053 = vrot.lane.b32.xlu0 %v1801_v31, %s2935_s30  ;;  %v2433_v43 = vpop.f32.mrb[39].mxu1 }
 0x6e3   : > { %v230_v43 = vld [vmem:[%s4154_s3] sm:$0xf] }
 0x6f1   : > { %v1943_v59 = vpop.f32.mrb[40].mxu1 }
 0x6f2   : > { %v1945_v33 = vpop.f32.mrb[41].mxu1 }
 0x6f5   : > { %v1948_v34 = vpop.f32.mrb[42].mxu1 }
 0x6f6   : > { %v2502_v39 = vpack.c.bf16 %v1948_v34, %v1943_v59  ;;  %v1950_v57 = vpop.f32.mrb[43].mxu1  ;;  %v2050_v59 = vpop.permute.xlu1 %2049 }
 0x6f7   : > { %v2060_v34 = vsel %vm1233_vm3, %v3972_v13, %v2050_v59 }
 0x6f8   : > { %2504 = vmatpush3.bf16.xpose.msk.msra.mxu1 %vm3884_vm4, %v2502_v39 }
 0x6f9   : > { %v1953_v49 = vpop.f32.mrb[44].mxu1  ;;  %2505 = vmatprep.subr.bf16.mxu1 %v2932_v24  ;;  %v4287_v24 = vld [vmem:[#allocation18_spill] sm:$0xff] }
 0x6fa   : > { %v1955_v38 = vpop.f32.mrb[45].mxu1  ;;  %v4289_v11 = vpack.c.bf16 %v4287_v24, %v4288_v63  ;;  %v2938_v63 = vmov 1  }
 0x6fd   : > { %v1958_v1 = vpop.f32.mrb[46].mxu1 }
 0x6fe   : > { %v2506_v26 = vpack.c.bf16 %v1958_v1, %v1953_v49  ;;  %v1960_v6 = vpop.f32.mrb[47].mxu1 }
 0x700   : > { %2508 = vmatpush3.bf16.xpose.msk.msra.mxu1 %vm3884_vm4, %v2506_v26 }
 0x701   : > { %2510 = vmatprep.subr.bf16.mxu1 %v4283_v41 }
 0x707   : > { %2443 = vmatmul.mubr.msk.f32.vlgmr.msra.gmra.mrb[48].mxu1 %vm1233_vm3, %v1963_v29 }
 0x708   : > { %2512 = vmatpush1.bf16.msra.mxu1 %v4286_v46  ;;  %2134 = vmatprep.mubr.f32.mxu1 %v4257_v25  ;;  %v4302_v25 = vld [vmem:[#allocation22_spill] sm:$0xff] }
 0x709   : > { %2514 = vmatprep.subr.bf16.mxu1 %v4289_v11  ;;  %v4304_v44 = vpack.c.bf16 %v4302_v25, %v4303_v56  ;;  %v2939_v11 = vmov 2  }
 0x70a   : > { %2617 = vset.pattern.permute.xlu1 %v2939_v11 }
 0x70c   : > { %2516 = vmatpush1.bf16.msra.mxu1 %v4292_v10 }
 0x70d   : > { %2518 = vmatprep.subr.bf16.mxu1 %v4295_v15 }
 0x710   : > { %2520 = vmatpush1.bf16.msra.mxu1 %v4298_v2 }
 0x711   : > { %2522 = vmatprep.subr.bf16.mxu1 %v4301_v62 }
 0x714   : > { %2524 = vmatpush1.bf16.msra.mxu1 %v4304_v44 }
 0x715   : > { %2526 = vmatprep.subr.bf16.mxu1 %v4307_v12 }
 0x718   : > { %2528 = vmatpush1.bf16.msra.mxu1 %v4310_v17 }
 0x719   : > { %2530 = vmatprep.subr.bf16.mxu1 %v4313_v58 }
 0x71c   : > { %2532 = vmatpush1.bf16.msra.mxu1 %v4316_v37 }
 0x71d   : > { %2534 = vmatprep.subr.bf16.mxu1 %v4319_v53 }
 0x720   : > { %2536 = vmatpush1.bf16.msra.mxu1 %v4322_v5 }
 0x721   : > { %2538 = vmatprep.subr.bf16.mxu1 %v4325_v7 }
 0x724   : > { %2540 = vmatpush1.bf16.msra.mxu1 %v4328_v28 }
 0x754   : > { %v2054_v33 = vpop.permute.xlu0 %2053 }
 0x755   : > { %v2062_v39 = vsel %vm2061_vm5, %v2060_v34, %v2054_v33 }
 0x7da   : > { %v2044_v21 = vpop.f32.mrb[48].mxu1 }
 0x7db   : > { %2057 = vrot.lane.b32.xlu0 %v2044_v21, %s2934_s25  ;;  %v2444_v31 = vpop.f32.mrb[49].mxu1  ;;  %s2213_s25 = sshll.u32 %s226_s23, 4  ;;  %s4109_s25 = int_to_ptr.vmem [resolvable:$true] %s2213_s25 }
 0x7dc   : > { %p2864_p13 = scmp.lt.s32.totalorder %s4109_s25, %s2862_s10 }
 0x7df   : > { %2067 = vperm.xlu0 %2615, %v230_v43  }
 0x7e3   : > { %2616 = vset.pattern.permute.xlu0 %v2938_v63 }
 0x84d   : > { %v2058_v57 = vpop.permute.xlu0 %2057 }
 0x84e   : > { %v2064_v49 = vsel %vm2063_vm6, %v2062_v39, %v2058_v57 }
 0x84f   : > { %2135 = vmatmul.mubr.f32.vlgmr.msra.gmra.mrb[50].mxu1 %v2064_v49 }
 0x85e   : > { %v2068_v38 = vpop.permute.xlu0 %2067 }
 0x922   : > { %v2136_v1 = vpop.f32.mrb[50].mxu1 }
 0x923   : > { %v2137_v26 = vadd.f32 %v2136_v1, %v2068_v38  ;;  %v2138_v6 = vpop.f32.mrb[51].mxu1 }
 0x924   : > { %v2139_v20 = vadd.f32 %v2138_v6, %v2068_v38 }
 0x925   : > { %v2141_v0 = vsel %vm478_vm0, %v2137_v26, 0.0  ;;  %v2153_v41 = vmul.f32 %v2137_v26, %v2137_v26 }
 0x926   : > { %v2142_v29 = vsel %vm478_vm0, %v2139_v20, 0.0  ;;  %v2154_v32 = vmul.f32 %v2139_v20, %v2139_v20 }
 0x927   : > { %v2143_v42 = vadd.f32 %v2142_v29, %v2141_v0  ;;  %v2155_v46 = vsel %vm478_vm0, %v2153_v41, 0.0 }
 0x928   : > { %v2156_v13 = vsel %vm478_vm0, %v2154_v32, 0.0 }
 0x929   : > { %2144 = vadd.xlane.f32.xlu1 %v2143_v42  ;;  %v2157_v24 = vadd.f32 %v2156_v13, %v2155_v46 }
 0x92b   : > { %2158 = vadd.xlane.f32.xlu0 %v2157_v24 }
 0x93a   : > { %2188 = vperm.xlu1 %2617, %v230_v43  }
 0x941   : > { %2182 = vperm.xlu0 %2616, %v230_v43  }
 0x945   : > { %2618 = vset.pattern.permute.xlu0 %v2939_v11 }
 0x9b6   : > { %v2145_v54 = vpop.xlane.xlu1 %2144 }
 0x9b7   : > { %v2146_v23 = vrot.slane %v2145_v54, 4 }
 0x9b8   : > { %v2159_v10 = vpop.xlane.xlu0 %2158 }
 0x9b9   : > { %v2147_v19 = vadd.f32 %v2146_v23, %v2145_v54  ;;  %v2160_v16 = vrot.slane %v2159_v10, 4 }
 0x9ba   : > { %v2189_v58 = vpop.permute.xlu1 %2188 }
 0x9bb   : > { %v2148_v15 = vrot.slane %v2147_v19, 2  ;;  %v2161_v51 = vadd.f32 %v2160_v16, %v2159_v10 }
 0x9bd   : > { %v2162_v61 = vrot.slane %v2161_v51, 2  ;;  %v2149_v2 = vadd.f32 %v2148_v15, %v2147_v19 }
 0x9bf   : > { %v2150_v55 = vrot.slane %v2149_v2, 1  ;;  %v2163_v60 = vadd.f32 %v2162_v61, %v2161_v51 }
 0x9c0   : > { %v2183_v17 = vpop.permute.xlu0 %2182 }
 0x9c1   : > { %v2151_v62 = vadd.f32 %v2150_v55, %v2149_v2  ;;  %v2164_v25 = vrot.slane %v2163_v60, 1 }
 0x9c3   : > { %2543 = vpush %v2151_v62  ;;  %v2165_v56 = vadd.f32 %v2164_v25, %v2163_v60 }
 0x9c5   : > { %2545 = vpush %v2165_v56 }
 0x9f4   : > { %s2544_s14 = spop %2543 }
 0x9f5   : > { %s2167_s28 = smul.f32 0.0009765625, %s2544_s14  ;;  %s2857_s14 = scalar_lea.vmem %s4109_s25, 128 }
 0x9f6   : > { %s2546_s27 = spop %2545  ;;  %p2858_p6 = scmp.ne.s32.totalorder %s4109_s25, %s2857_s14 }
 0x9f7   : > { %s2169_s5 = smul.f32 %s2167_s28, %s2167_s28  ;;  %v2171_v18 = vstv %s2167_s28  ;;  %s2863_s28 = scalar_lea.vmem %s2862_s10, 256 }
 0x9f8   : > { %s2168_s6 = smul.f32 0.0009765625, %s2546_s27  ;;  %v2172_v12 = vsub.f32 %v2137_v26, %v2171_v18  ;;  %v2173_v48 = vsub.f32 %v2139_v20, %v2171_v18  ;;  %p2859_p9 = pnand %p2858_p6, %p3058_p8 }
 0x9f9   : > { %p2865_p0 = scmp.lt.s32.totalorder %s2863_s28, %s2857_s14 }
 0x9fa   : > { %s2170_s7 = ssub.f32 %s2168_s6, %s2169_s5  ;;  %p2860_p12 = pneg %p2859_p9 }
 0x9fb   : > { %p2866_p5 = por %p2865_p0, %p2864_p13 }
 0x9fc   : > { %s2174_s11 = sadd.f32 1e-05, %s2170_s7 }
 0x9fd   : > { %p2867_p10 = pnand %p2866_p5, %p2860_p12 }
 0x9fe   : > { %v2175_v44 = vstv %s2174_s11 }
 0x9ff   : > { %2797 = vrsqrt.f32 %v2175_v44 }
 0xa09   : > { %v2798_v35 = vpop.eup %2797 }
 0xa0a   : > { %2547 = vpush %v2798_v35 }
 0xa3b   : > { %s2548_s12 = spop %2547 }
 0xa3c   : > { %v2178_v22 = vstv %s2548_s12 }
 0xa3d   : > { %v2179_v40 = vmul.f32 %v2178_v22, %v2172_v12  ;;  %v2180_v47 = vmul.f32 %v2178_v22, %v2173_v48 }
 0xa3f   : > { %v2185_v50 = vmul.f32 %v2183_v17, %v2179_v40  ;;  %v2186_v36 = vmul.f32 %v2183_v17, %v2180_v47 }
 0xa41   : > { %v2191_v37 = vadd.f32 %v2189_v58, %v2185_v50  ;;  %v2192_v45 = vadd.f32 %v2189_v58, %v2186_v36 }
 0xa43   : > { %v2195_v14 = vcombine.low %v2191_v37, %v2192_v45 }
 0xa45   : > { %2197 = vst [vmem:[%s226_s23] sm:$0xff] %v2195_v14 }
 0xa46   : > { %2870 = shalt.err (!%p2867_p10)
}
 0xa47   : > { %s2871_s29 = scalar_lea.hbm %s4107_s9, 128  ;;  %s2875_s6 = scalar_lea.hbm %s4155_s4, 256 }
 0xa48   : > { %p2872_p1 = scmp.ne.s32.totalorder %s4107_s9, %s2871_s29  ;;  %p2876_p3 = scmp.lt.u32.totalorder %s4107_s9, %s4155_s4 }
 0xa49   : > { %p2877_p11 = scmp.lt.u32.totalorder %s2875_s6, %s2871_s29  ;;  %p2879_p6 = scmp.lt.u32.totalorder %s2871_s29, %s4107_s9 }
 0xa4a   : > { %p2873_p2 = pnand %p2872_p1, %p3058_p8 }
 0xa4b   : > { %p2878_p4 = por %p2877_p11, %p2876_p3 }
 0xa4c   : > { %p2874_p7 = pneg %p2873_p2 }
 0xa4d   : > { %p2880_p9 = por %p2879_p6, %p2878_p4 }
 0xa4f   : > { %p2881_p12 = pnand %p2880_p9, %p2874_p7 }
 0xa51   : > { %2884 = shalt.err (!%p2881_p12)
}
 0xa52   : > { %2555 = dma.vmem_to_hbm [thread:$0]  (%p3058_p8), %s4109_s25, 128, %s4107_s9, %s2199_s13  }
 0xa53 PF: > { %s2225_s12 = sand.u32 1, %s2915_s15   ;;  %p4329_p13 = scmp.ne.s32.totalorder %s4199_s22, 0 }
 0xa54   : > { %p4330_p0 = scmp.ge.s32.totalorder %s2927_s18, 2  ;;  %s2226_s21 = scalar_lea.sflag [#allocation4], %s2225_s12 }
 0xa56   : > { %p2566_p5 = pnand %p4330_p0, %p4329_p13 }
 0xa58   : > { %2910 = dma.done.wait (!%p2566_p5), %s2226_s21, 128  }
 0xa59   : > { %2912 = vsyncadd (!%p2566_p5), %s2226_s21, 4294967168  ;;  %p18_p10 = scmp.ge.s32.totalorder %s3014_s26, 4   ;;  %s4331_s15 = smov %s2919_s16 }
 0xa5a   : > { %s4332_s16 = smov %s2923_s17  ;;  %s4333_s17 = smov %s3050_s20 }
 0xa5b   : > { %s4334_s18 = smov %s3014_s26  ;;  %20 = sbr.rel (!%p18_p10) target bundleno = 6 (0x6), region = 85 }
 0xa62   :  { %2231 = vsyncpa [#allocation3], 1 }
 0xa63   :  { %2233 = vsyncpa [#allocation3 + $0x1], 1 }
 0xa64   :  { %2234 = vsyncpa [#allocation6], 1 }
 0xa65   :  { %2235 = vsyncpa [#allocation4], 1 }
 0xa66   :  { %2237 = vsyncpa [#allocation4 + $0x1], 1 }

</bundles_post_ra>
